<compile_context>
chip_gen: v5e
topology: v5e:2x2
jax: 0.10.0
libtpu: 0.0.40
codegen_flags: <defaults>
</compile_context>

<pallas_src>
import functools

import jax
import jax.numpy as jnp
from jax.experimental import pallas as pl
from jax.experimental.pallas import tpu as pltpu


# ------------------------- Pallas kernels -------------------------

def _pair_mean_kernel(x1_ref, x2_ref, m_ref, acc_ref, *, hw, hw_tile,
                      half_inv_hw):
    # Tiled spatial reduction: acc(BC,128) += lane-folded sum of (x1 + x2);
    # emit the broadcast mean on the last block only.
    j = pl.program_id(0)

    @pl.when(j == 0)
    def _():
        acc_ref[...] = jnp.zeros_like(acc_ref)

    s = x1_ref[...].astype(jnp.float32) + x2_ref[...].astype(jnp.float32)
    if hw % hw_tile != 0:  # static check: mask the out-of-bounds tail block
        col = jax.lax.broadcasted_iota(jnp.int32, s.shape, 1) + j * hw_tile
        s = jnp.where(col < hw, s, 0.0)

    # Lane-dense partial sums: fold the tile into 128 lanes with VPU adds
    # only; the single cross-lane (XLU) reduce happens once, at the end.
    part = s[:, 0:128]
    for k in range(1, hw_tile // 128):
        part = part + s[:, k * 128:(k + 1) * 128]
    acc_ref[...] += part

    @pl.when(j == pl.num_programs(0) - 1)
    def _():
        total = jnp.sum(acc_ref[...], axis=-1, keepdims=True)        # (BC, 1)
        m_ref[...] = jnp.broadcast_to(total * jnp.float32(half_inv_hw),
                                      m_ref.shape).astype(m_ref.dtype)


def _fused_head_kernel(f1_ref, f2_ref, w1_ref, w2_ref, m_ref, b_ref, o_ref):
    # 1x1-conv head fusion with the input-mean subtraction and the
    # bias + output-mean add-back folded in:
    #   out = (f1 - m) @ w1 + (f2 - m) @ w2 + (bias + mean)
    m = m_ref[0].astype(f1_ref.dtype)                     # (1, nf), per batch
    a1 = f1_ref[...] - m
    a2 = f2_ref[...] - m
    acc = jnp.dot(a1, w1_ref[...], preferred_element_type=jnp.float32)
    acc = acc + jnp.dot(a2, w2_ref[...], preferred_element_type=jnp.float32)
    o_ref[...] = (acc + b_ref[0]).astype(o_ref.dtype)


# ------------------------- tiling heuristics -------------------------

def _pick_hw_tile(bc, hw, budget_bytes=8 << 20, max_cols_cap=16384):
    # Largest multiple-of-128 column tile such that the two double-buffered
    # f32 input tiles fit the budget (~half the v5e scoped-VMEM default).
    bytes_per_col = 2 * 2 * bc * 4              # 2 inputs x 2 buffers x f32
    t = min(hw, budget_bytes // bytes_per_col, max_cols_cap)
    t = max(128, (t // 128) * 128)
    return t


def _pick_tm(p_rows, batch, nf, act_bytes, budget_bytes=24 << 20,
             want_steps=4):
    # Resident (double-buffered) weights + double-buffered f1/f2/out tiles.
    fixed = 2 * (2 * nf * nf * act_bytes) + 4 * nf * 4
    per_row = 2 * (2 * nf * act_bytes + nf * 4)
    tm_cap = max(8, (budget_bytes - fixed) // per_row)
    tm = None
    for cand in (2048, 1024, 512, 256, 128, 64, 32, 16, 8):
        if cand <= tm_cap and p_rows % cand == 0:
            tm = cand
            break
    if tm is None:
        tm = p_rows            # odd (training-mode) sizes only
    # Keep >= want_steps grid points so multi-TensorCore chips (v7x) stay busy.
    while (batch * (p_rows // tm) < want_steps and tm > 8 and tm % 2 == 0
           and p_rows % (tm // 2) == 0):
        tm //= 2
    return tm


# ------------------------- Pallas wrappers -------------------------

def pair_mean(x1f, x2f):
    # x*f: (BC, HW) -> lane-dense per-row shared mean (BC, 128).
    BC, HW = x1f.shape
    hw_tile = _pick_hw_tile(BC, HW)
    nblk = pl.cdiv(HW, hw_tile)
    kern = functools.partial(_pair_mean_kernel, hw=HW, hw_tile=hw_tile,
                             half_inv_hw=0.5 / HW)
    return pl.pallas_call(
        kern,
        out_shape=jax.ShapeDtypeStruct((BC, 128), jnp.float32),
        grid=(nblk,),
        in_specs=[pl.BlockSpec((BC, hw_tile), lambda j: (0, j)),
                  pl.BlockSpec((BC, hw_tile), lambda j: (0, j))],
        out_specs=pl.BlockSpec((BC, 128), lambda j: (0, 0)),
        scratch_shapes=[pltpu.VMEM((BC, 128), jnp.float32)],
        compiler_params=pltpu.CompilerParams(
            dimension_semantics=("arbitrary",)),
    )(x1f, x2f)


def interpolation_head_fused(f1, f2, w1, w2, mrow, bm):
    # f1, f2: (B, h, w, nf) channels-last shuffled features (f32 or bf16).
    # w1/w2: (nf, nf) split weights; mrow/bm: (B, 1, nf) f32 per-batch rows.
    B, h, w, nf = f1.shape
    P = h * w
    M = B * P
    act_bytes = jnp.dtype(f1.dtype).itemsize
    tm = _pick_tm(P, B, nf, act_bytes)
    bpb = P // tm
    f1m = f1.reshape(M, nf)
    f2m = f2.reshape(M, nf)

    flops = 2 * 2 * M * nf * nf
    bytes_accessed = (2 * M * nf * act_bytes       # f1, f2 reads
                      + M * nf * 4                 # f32 output writeback
                      + 2 * nf * nf * act_bytes    # weights
                      + 2 * B * nf * 4)            # mean + bias rows

    out = pl.pallas_call(
        _fused_head_kernel,
        out_shape=jax.ShapeDtypeStruct((M, nf), jnp.float32),
        grid=(B, bpb),
        in_specs=[
            pl.BlockSpec((tm, nf), lambda b, i: (b * bpb + i, 0)),
            pl.BlockSpec((tm, nf), lambda b, i: (b * bpb + i, 0)),
            pl.BlockSpec((nf, nf), lambda b, i: (0, 0)),
            pl.BlockSpec((nf, nf), lambda b, i: (0, 0)),
            pl.BlockSpec((1, 1, nf), lambda b, i: (b, 0, 0)),
            pl.BlockSpec((1, 1, nf), lambda b, i: (b, 0, 0)),
        ],
        out_specs=pl.BlockSpec((tm, nf), lambda b, i: (b * bpb + i, 0)),
        compiler_params=pltpu.CompilerParams(
            dimension_semantics=("parallel", "parallel"),
            vmem_limit_bytes=32 * 1024 * 1024),
        cost_estimate=pl.CostEstimate(flops=flops, transcendentals=0,
                                      bytes_accessed=bytes_accessed),
    )(f1m, f2m, w1, w2, mrow, bm)
    return out.reshape(B, h, w, nf)


# ------------------------- JAX glue (pad / shuffle / params) -------------------------

def pixel_shuffle_down_nhwc(x, block):
    # NCHW -> channels-last shuffled (B, h, w, C*block*block), one transpose.
    B, C, H, W = x.shape
    h, w = H // block, W // block
    x = x.reshape(B, C, h, block, w, block)
    x = x.transpose(0, 2, 4, 1, 3, 5)          # (B, h, w, C, bh, bw)
    return x.reshape(B, h, w, C * block * block)


def pixel_shuffle_up_nhwc(x, block):
    # channels-last (B, h, w, oc*block*block) -> NCHW (B, oc, h*block, w*block).
    B, h, w, nf = x.shape
    oc = nf // (block * block)
    x = x.reshape(B, h, w, oc, block, block)
    x = x.transpose(0, 3, 1, 4, 2, 5)          # (B, oc, h, bh, w, bw)
    return x.reshape(B, oc, h * block, w * block)


def in_out_padding_amounts(H, W):
    pw = 0 if W == (W >> 7 << 7) else ((((W >> 7) + 1) << 7) - W)
    ph = 0 if H == (H >> 7 << 7) else ((((H >> 7) + 1) << 7) - H)
    return ph // 2, ph - ph // 2, pw // 2, pw - pw // 2


def tain_forward(x1, x2, params, depth=3, training=False,
                 act_dtype=jnp.float32):
    block = 2 ** depth
    B, C, H, W = x1.shape
    BC, HW = B * C, H * W
    nf = C * block * block

    # Shared per-(batch, channel) spatial mean of the two frames (Pallas
    # reduction).  No sub_mean pass: subtraction/add-back fold into the head.
    m_lane = pair_mean(x1.reshape(BC, HW), x2.reshape(BC, HW))
    mi = m_lane[:, 0].reshape(B, C)

    if not training:
        pt, pb, plft, prt = in_out_padding_amounts(H, W)
        pad = ((0, 0), (0, 0), (pt, pb), (plft, prt))
        x1 = jnp.pad(x1, pad, mode="reflect")
        x2 = jnp.pad(x2, pad, mode="reflect")

    f1 = pixel_shuffle_down_nhwc(x1, block).astype(act_dtype)   # (B, h, w, nf)
    f2 = pixel_shuffle_down_nhwc(x2, block).astype(act_dtype)

    w, b = params["w"], params["b"]
    w1 = w[:nf].astype(act_dtype)
    w2 = w[nf:].astype(act_dtype)
    m_tab = jnp.repeat(mi, block * block, axis=1)        # (B, nf)
    mrow = m_tab.reshape(B, 1, nf)                       # subtracted in-kernel
    bm = (b[None, :] + m_tab).reshape(B, 1, nf)          # bias + mean add-back

    feats = interpolation_head_fused(f1, f2, w1, w2, mrow, bm)  # f32
    out = pixel_shuffle_up_nhwc(feats, block)            # (B, C, Hp, Wp)

    if not training:
        Hp, Wp = out.shape[2], out.shape[3]
        out = out[:, :, pt:Hp - pb, plft:Wp - prt]
    return out


# ------------------------- pure-JAX reference -------------------------

def _ref_shuffle_down(x, block):
    B, C, H, W = x.shape
    x = x.reshape(B, C, H // block, block, W // block, block)
    x = x.transpose(0, 1, 3, 5, 2, 4)
    return x.reshape(B, C * block * block, H // block, W // block)


def _ref_shuffle_up(x, block):
    B, C, H, W = x.shape
    oc = C // (block * block)
    x = x.reshape(B, oc, block, block, H, W)
    x = x.transpose(0, 1, 4, 2, 5, 3)
    return x.reshape(B, oc, H * block, W * block)


def tain_reference(x1, x2, params, depth=3, training=False):
    block = 2 ** depth
    m1 = x1.mean(axis=(2, 3), keepdims=True)
    m2 = x2.mean(axis=(2, 3), keepdims=True)
    mi = (m1 + m2) * 0.5
    x1 = x1 - mi
    x2 = x2 - mi
    if not training:
        pt, pb, plft, prt = in_out_padding_amounts(x1.shape[2], x1.shape[3])
        pad = ((0, 0), (0, 0), (pt, pb), (plft, prt))
        x1 = jnp.pad(x1, pad, mode="reflect")
        x2 = jnp.pad(x2, pad, mode="reflect")
    f1 = _ref_shuffle_down(x1, block)
    f2 = _ref_shuffle_down(x2, block)
    B, nf, h, wd = f1.shape
    x = jnp.concatenate([f1, f2], axis=1).transpose(0, 2, 3, 1)
    y = x.reshape(-1, 2 * nf) @ params["w"] + params["b"]
    feats = y.reshape(B, h, wd, nf).transpose(0, 3, 1, 2)
    out = _ref_shuffle_up(feats, block)
    if not training:
        Hp, Wp = out.shape[2], out.shape[3]
        out = out[:, :, pt:Hp - pb, plft:Wp - prt]
    return out + mi


# ------------------------- main -------------------------

if __name__ == "__main__":
    depth = 3
    in_channels = 3
    nf = in_channels * 4 ** depth          # 192
    B, H, W = 2, 96, 96                    # reflection pad 96 -> 128 is valid

    key = jax.random.PRNGKey(0)
    k1, k2, k3, k4 = jax.random.split(key, 4)
    x1 = jax.random.normal(k1, (B, in_channels, H, W), dtype=jnp.float32)
    x2 = jax.random.normal(k2, (B, in_channels, H, W), dtype=jnp.float32)

    # Deterministic parameters for the interpolation head fusion (1x1 conv).
    params = {
        "w": jax.random.normal(k3, (2 * nf, nf), dtype=jnp.float32) * 0.02,
        "b": jax.random.normal(k4, (nf,), dtype=jnp.float32) * 0.01,
    }

    # f32 path: bit-faithful to the reference arithmetic, checked at 1e-4.
    fwd_f32 = jax.jit(functools.partial(tain_forward, depth=depth,
                                        training=False,
                                        act_dtype=jnp.float32))
    out = jax.block_until_ready(fwd_f32(x1, x2, params))
    ref = tain_reference(x1, x2, params, depth=depth, training=False)
    assert out.shape == (B, in_channels, H, W), out.shape
    max_err = float(jnp.max(jnp.abs(out - ref)))
    assert jnp.allclose(out, ref, atol=1e-4, rtol=1e-4), max_err

    # bf16 activation/weight path (f32 accumulation) - the native MXU rate
    # and ~half the activation/weight DMA on v6e/v7x/v5e.  Validated at a
    # bf16-rounding tolerance (inputs rounded to ~2^-9 relative over K=384).
    fwd_bf16 = jax.jit(functools.partial(tain_forward, depth=depth,
                                         training=False,
                                         act_dtype=jnp.bfloat16))
    out_bf16 = jax.block_until_ready(fwd_bf16(x1, x2, params))
    max_err_bf16 = float(jnp.max(jnp.abs(out_bf16 - ref)))
    assert jnp.allclose(out_bf16, ref, atol=3e-2, rtol=3e-2), max_err_bf16

    print("KERNEL_OK")
</pallas_src>

<mosaic_0001>
module attributes {stable_mosaic.version = 11 : i64} {
  func.func @_pair_mean_kernel(%arg0: i32, %arg1: memref<6x9216xf32, #tpu.memory_space<vmem>>, %arg2: memref<6x9216xf32, #tpu.memory_space<vmem>>, %arg3: memref<6x128xf32, #tpu.memory_space<vmem>>, %arg4: memref<6x128xf32, #tpu.memory_space<vmem>>) attributes {dimension_semantics = [#tpu.dimension_semantics<arbitrary>], iteration_bounds = array<i64: 1>, scalar_prefetch = 0 : i64, scratch_operands = 1 : i64, tpu.core_type = #tpu.core_type<tc>, window_params = [{transform_indices = @transform_0, window_bounds = array<i64: 6, 9216>}, {transform_indices = @transform_1, window_bounds = array<i64: 6, 9216>}, {pipeline_mode = #tpu.pipeline_mode<synchronous>, transform_indices = @transform_2, window_bounds = array<i64: 6, 128>}]} {
    %c0_i32 = arith.constant 0 : i32
    %0 = arith.cmpi eq, %arg0, %c0_i32 : i32
    %1 = arith.extui %0 : i1 to i32
    %c0_i32_0 = arith.constant 0 : i32
    %2 = arith.cmpi ne, %1, %c0_i32_0 : i32
    scf.if %2 {
      %cst = arith.constant 0.000000e+00 : f32
      %155 = vector.broadcast %cst : f32 to vector<6x128xf32>
      %c0_10 = arith.constant 0 : index
      %c0_11 = arith.constant 0 : index
      %156 = vector.load %arg4[%c0_10, %c0_11] : memref<6x128xf32, #tpu.memory_space<vmem>>, vector<6x128xf32>
      tpu.vector_store %arg4[%c0_10, %c0_11], %155 {strides = array<i32>} : memref<6x128xf32, #tpu.memory_space<vmem>>, vector<6x128xf32>,
    } else {
    }
    %c0 = arith.constant 0 : index
    %c0_1 = arith.constant 0 : index
    %3 = vector.load %arg1[%c0, %c0_1] : memref<6x9216xf32, #tpu.memory_space<vmem>>, vector<6x9216xf32>
    %c0_2 = arith.constant 0 : index
    %c0_3 = arith.constant 0 : index
    %4 = vector.load %arg2[%c0_2, %c0_3] : memref<6x9216xf32, #tpu.memory_space<vmem>>, vector<6x9216xf32>
    %5 = arith.addf %3, %4 : vector<6x9216xf32>
    %6 = vector.extract_strided_slice %5 {offsets = [0, 0], sizes = [6, 128], strides = [1, 1]} : vector<6x9216xf32> to vector<6x128xf32>
    %7 = vector.extract_strided_slice %5 {offsets = [0, 128], sizes = [6, 128], strides = [1, 1]} : vector<6x9216xf32> to vector<6x128xf32>
    %8 = arith.addf %6, %7 : vector<6x128xf32>
    %9 = vector.extract_strided_slice %5 {offsets = [0, 256], sizes = [6, 128], strides = [1, 1]} : vector<6x9216xf32> to vector<6x128xf32>
    %10 = arith.addf %8, %9 : vector<6x128xf32>
    %11 = vector.extract_strided_slice %5 {offsets = [0, 384], sizes = [6, 128], strides = [1, 1]} : vector<6x9216xf32> to vector<6x128xf32>
    %12 = arith.addf %10, %11 : vector<6x128xf32>
    %13 = vector.extract_strided_slice %5 {offsets = [0, 512], sizes = [6, 128], strides = [1, 1]} : vector<6x9216xf32> to vector<6x128xf32>
    %14 = arith.addf %12, %13 : vector<6x128xf32>
    %15 = vector.extract_strided_slice %5 {offsets = [0, 640], sizes = [6, 128], strides = [1, 1]} : vector<6x9216xf32> to vector<6x128xf32>
    %16 = arith.addf %14, %15 : vector<6x128xf32>
    %17 = vector.extract_strided_slice %5 {offsets = [0, 768], sizes = [6, 128], strides = [1, 1]} : vector<6x9216xf32> to vector<6x128xf32>
    %18 = arith.addf %16, %17 : vector<6x128xf32>
    %19 = vector.extract_strided_slice %5 {offsets = [0, 896], sizes = [6, 128], strides = [1, 1]} : vector<6x9216xf32> to vector<6x128xf32>
    %20 = arith.addf %18, %19 : vector<6x128xf32>
    %21 = vector.extract_strided_slice %5 {offsets = [0, 1024], sizes = [6, 128], strides = [1, 1]} : vector<6x9216xf32> to vector<6x128xf32>
    %22 = arith.addf %20, %21 : vector<6x128xf32>
    %23 = vector.extract_strided_slice %5 {offsets = [0, 1152], sizes = [6, 128], strides = [1, 1]} : vector<6x9216xf32> to vector<6x128xf32>
    %24 = arith.addf %22, %23 : vector<6x128xf32>
    %25 = vector.extract_strided_slice %5 {offsets = [0, 1280], sizes = [6, 128], strides = [1, 1]} : vector<6x9216xf32> to vector<6x128xf32>
    %26 = arith.addf %24, %25 : vector<6x128xf32>
    %27 = vector.extract_strided_slice %5 {offsets = [0, 1408], sizes = [6, 128], strides = [1, 1]} : vector<6x9216xf32> to vector<6x128xf32>
    %28 = arith.addf %26, %27 : vector<6x128xf32>
    %29 = vector.extract_strided_slice %5 {offsets = [0, 1536], sizes = [6, 128], strides = [1, 1]} : vector<6x9216xf32> to vector<6x128xf32>
    %30 = arith.addf %28, %29 : vector<6x128xf32>
    %31 = vector.extract_strided_slice %5 {offsets = [0, 1664], sizes = [6, 128], strides = [1, 1]} : vector<6x9216xf32> to vector<6x128xf32>
    %32 = arith.addf %30, %31 : vector<6x128xf32>
    %33 = vector.extract_strided_slice %5 {offsets = [0, 1792], sizes = [6, 128], strides = [1, 1]} : vector<6x9216xf32> to vector<6x128xf32>
    %34 = arith.addf %32, %33 : vector<6x128xf32>
    %35 = vector.extract_strided_slice %5 {offsets = [0, 1920], sizes = [6, 128], strides = [1, 1]} : vector<6x9216xf32> to vector<6x128xf32>
    %36 = arith.addf %34, %35 : vector<6x128xf32>
    %37 = vector.extract_strided_slice %5 {offsets = [0, 2048], sizes = [6, 128], strides = [1, 1]} : vector<6x9216xf32> to vector<6x128xf32>
    %38 = arith.addf %36, %37 : vector<6x128xf32>
    %39 = vector.extract_strided_slice %5 {offsets = [0, 2176], sizes = [6, 128], strides = [1, 1]} : vector<6x9216xf32> to vector<6x128xf32>
    %40 = arith.addf %38, %39 : vector<6x128xf32>
    %41 = vector.extract_strided_slice %5 {offsets = [0, 2304], sizes = [6, 128], strides = [1, 1]} : vector<6x9216xf32> to vector<6x128xf32>
    %42 = arith.addf %40, %41 : vector<6x128xf32>
    %43 = vector.extract_strided_slice %5 {offsets = [0, 2432], sizes = [6, 128], strides = [1, 1]} : vector<6x9216xf32> to vector<6x128xf32>
    %44 = arith.addf %42, %43 : vector<6x128xf32>
    %45 = vector.extract_strided_slice %5 {offsets = [0, 2560], sizes = [6, 128], strides = [1, 1]} : vector<6x9216xf32> to vector<6x128xf32>
    %46 = arith.addf %44, %45 : vector<6x128xf32>
    %47 = vector.extract_strided_slice %5 {offsets = [0, 2688], sizes = [6, 128], strides = [1, 1]} : vector<6x9216xf32> to vector<6x128xf32>
    %48 = arith.addf %46, %47 : vector<6x128xf32>
    %49 = vector.extract_strided_slice %5 {offsets = [0, 2816], sizes = [6, 128], strides = [1, 1]} : vector<6x9216xf32> to vector<6x128xf32>
    %50 = arith.addf %48, %49 : vector<6x128xf32>
    %51 = vector.extract_strided_slice %5 {offsets = [0, 2944], sizes = [6, 128], strides = [1, 1]} : vector<6x9216xf32> to vector<6x128xf32>
    %52 = arith.addf %50, %51 : vector<6x128xf32>
    %53 = vector.extract_strided_slice %5 {offsets = [0, 3072], sizes = [6, 128], strides = [1, 1]} : vector<6x9216xf32> to vector<6x128xf32>
    %54 = arith.addf %52, %53 : vector<6x128xf32>
    %55 = vector.extract_strided_slice %5 {offsets = [0, 3200], sizes = [6, 128], strides = [1, 1]} : vector<6x9216xf32> to vector<6x128xf32>
    %56 = arith.addf %54, %55 : vector<6x128xf32>
    %57 = vector.extract_strided_slice %5 {offsets = [0, 3328], sizes = [6, 128], strides = [1, 1]} : vector<6x9216xf32> to vector<6x128xf32>
    %58 = arith.addf %56, %57 : vector<6x128xf32>
    %59 = vector.extract_strided_slice %5 {offsets = [0, 3456], sizes = [6, 128], strides = [1, 1]} : vector<6x9216xf32> to vector<6x128xf32>
    %60 = arith.addf %58, %59 : vector<6x128xf32>
    %61 = vector.extract_strided_slice %5 {offsets = [0, 3584], sizes = [6, 128], strides = [1, 1]} : vector<6x9216xf32> to vector<6x128xf32>
    %62 = arith.addf %60, %61 : vector<6x128xf32>
    %63 = vector.extract_strided_slice %5 {offsets = [0, 3712], sizes = [6, 128], strides = [1, 1]} : vector<6x9216xf32> to vector<6x128xf32>
    %64 = arith.addf %62, %63 : vector<6x128xf32>
    %65 = vector.extract_strided_slice %5 {offsets = [0, 3840], sizes = [6, 128], strides = [1, 1]} : vector<6x9216xf32> to vector<6x128xf32>
    %66 = arith.addf %64, %65 : vector<6x128xf32>
    %67 = vector.extract_strided_slice %5 {offsets = [0, 3968], sizes = [6, 128], strides = [1, 1]} : vector<6x9216xf32> to vector<6x128xf32>
    %68 = arith.addf %66, %67 : vector<6x128xf32>
    %69 = vector.extract_strided_slice %5 {offsets = [0, 4096], sizes = [6, 128], strides = [1, 1]} : vector<6x9216xf32> to vector<6x128xf32>
    %70 = arith.addf %68, %69 : vector<6x128xf32>
    %71 = vector.extract_strided_slice %5 {offsets = [0, 4224], sizes = [6, 128], strides = [1, 1]} : vector<6x9216xf32> to vector<6x128xf32>
    %72 = arith.addf %70, %71 : vector<6x128xf32>
    %73 = vector.extract_strided_slice %5 {offsets = [0, 4352], sizes = [6, 128], strides = [1, 1]} : vector<6x9216xf32> to vector<6x128xf32>
    %74 = arith.addf %72, %73 : vector<6x128xf32>
    %75 = vector.extract_strided_slice %5 {offsets = [0, 4480], sizes = [6, 128], strides = [1, 1]} : vector<6x9216xf32> to vector<6x128xf32>
    %76 = arith.addf %74, %75 : vector<6x128xf32>
    %77 = vector.extract_strided_slice %5 {offsets = [0, 4608], sizes = [6, 128], strides = [1, 1]} : vector<6x9216xf32> to vector<6x128xf32>
    %78 = arith.addf %76, %77 : vector<6x128xf32>
    %79 = vector.extract_strided_slice %5 {offsets = [0, 4736], sizes = [6, 128], strides = [1, 1]} : vector<6x9216xf32> to vector<6x128xf32>
    %80 = arith.addf %78, %79 : vector<6x128xf32>
    %81 = vector.extract_strided_slice %5 {offsets = [0, 4864], sizes = [6, 128], strides = [1, 1]} : vector<6x9216xf32> to vector<6x128xf32>
    %82 = arith.addf %80, %81 : vector<6x128xf32>
    %83 = vector.extract_strided_slice %5 {offsets = [0, 4992], sizes = [6, 128], strides = [1, 1]} : vector<6x9216xf32> to vector<6x128xf32>
    %84 = arith.addf %82, %83 : vector<6x128xf32>
    %85 = vector.extract_strided_slice %5 {offsets = [0, 5120], sizes = [6, 128], strides = [1, 1]} : vector<6x9216xf32> to vector<6x128xf32>
    %86 = arith.addf %84, %85 : vector<6x128xf32>
    %87 = vector.extract_strided_slice %5 {offsets = [0, 5248], sizes = [6, 128], strides = [1, 1]} : vector<6x9216xf32> to vector<6x128xf32>
    %88 = arith.addf %86, %87 : vector<6x128xf32>
    %89 = vector.extract_strided_slice %5 {offsets = [0, 5376], sizes = [6, 128], strides = [1, 1]} : vector<6x9216xf32> to vector<6x128xf32>
    %90 = arith.addf %88, %89 : vector<6x128xf32>
    %91 = vector.extract_strided_slice %5 {offsets = [0, 5504], sizes = [6, 128], strides = [1, 1]} : vector<6x9216xf32> to vector<6x128xf32>
    %92 = arith.addf %90, %91 : vector<6x128xf32>
    %93 = vector.extract_strided_slice %5 {offsets = [0, 5632], sizes = [6, 128], strides = [1, 1]} : vector<6x9216xf32> to vector<6x128xf32>
    %94 = arith.addf %92, %93 : vector<6x128xf32>
    %95 = vector.extract_strided_slice %5 {offsets = [0, 5760], sizes = [6, 128], strides = [1, 1]} : vector<6x9216xf32> to vector<6x128xf32>
    %96 = arith.addf %94, %95 : vector<6x128xf32>
    %97 = vector.extract_strided_slice %5 {offsets = [0, 5888], sizes = [6, 128], strides = [1, 1]} : vector<6x9216xf32> to vector<6x128xf32>
    %98 = arith.addf %96, %97 : vector<6x128xf32>
    %99 = vector.extract_strided_slice %5 {offsets = [0, 6016], sizes = [6, 128], strides = [1, 1]} : vector<6x9216xf32> to vector<6x128xf32>
    %100 = arith.addf %98, %99 : vector<6x128xf32>
    %101 = vector.extract_strided_slice %5 {offsets = [0, 6144], sizes = [6, 128], strides = [1, 1]} : vector<6x9216xf32> to vector<6x128xf32>
    %102 = arith.addf %100, %101 : vector<6x128xf32>
    %103 = vector.extract_strided_slice %5 {offsets = [0, 6272], sizes = [6, 128], strides = [1, 1]} : vector<6x9216xf32> to vector<6x128xf32>
    %104 = arith.addf %102, %103 : vector<6x128xf32>
    %105 = vector.extract_strided_slice %5 {offsets = [0, 6400], sizes = [6, 128], strides = [1, 1]} : vector<6x9216xf32> to vector<6x128xf32>
    %106 = arith.addf %104, %105 : vector<6x128xf32>
    %107 = vector.extract_strided_slice %5 {offsets = [0, 6528], sizes = [6, 128], strides = [1, 1]} : vector<6x9216xf32> to vector<6x128xf32>
    %108 = arith.addf %106, %107 : vector<6x128xf32>
    %109 = vector.extract_strided_slice %5 {offsets = [0, 6656], sizes = [6, 128], strides = [1, 1]} : vector<6x9216xf32> to vector<6x128xf32>
    %110 = arith.addf %108, %109 : vector<6x128xf32>
    %111 = vector.extract_strided_slice %5 {offsets = [0, 6784], sizes = [6, 128], strides = [1, 1]} : vector<6x9216xf32> to vector<6x128xf32>
    %112 = arith.addf %110, %111 : vector<6x128xf32>
    %113 = vector.extract_strided_slice %5 {offsets = [0, 6912], sizes = [6, 128], strides = [1, 1]} : vector<6x9216xf32> to vector<6x128xf32>
    %114 = arith.addf %112, %113 : vector<6x128xf32>
    %115 = vector.extract_strided_slice %5 {offsets = [0, 7040], sizes = [6, 128], strides = [1, 1]} : vector<6x9216xf32> to vector<6x128xf32>
    %116 = arith.addf %114, %115 : vector<6x128xf32>
    %117 = vector.extract_strided_slice %5 {offsets = [0, 7168], sizes = [6, 128], strides = [1, 1]} : vector<6x9216xf32> to vector<6x128xf32>
    %118 = arith.addf %116, %117 : vector<6x128xf32>
    %119 = vector.extract_strided_slice %5 {offsets = [0, 7296], sizes = [6, 128], strides = [1, 1]} : vector<6x9216xf32> to vector<6x128xf32>
    %120 = arith.addf %118, %119 : vector<6x128xf32>
    %121 = vector.extract_strided_slice %5 {offsets = [0, 7424], sizes = [6, 128], strides = [1, 1]} : vector<6x9216xf32> to vector<6x128xf32>
    %122 = arith.addf %120, %121 : vector<6x128xf32>
    %123 = vector.extract_strided_slice %5 {offsets = [0, 7552], sizes = [6, 128], strides = [1, 1]} : vector<6x9216xf32> to vector<6x128xf32>
    %124 = arith.addf %122, %123 : vector<6x128xf32>
    %125 = vector.extract_strided_slice %5 {offsets = [0, 7680], sizes = [6, 128], strides = [1, 1]} : vector<6x9216xf32> to vector<6x128xf32>
    %126 = arith.addf %124, %125 : vector<6x128xf32>
    %127 = vector.extract_strided_slice %5 {offsets = [0, 7808], sizes = [6, 128], strides = [1, 1]} : vector<6x9216xf32> to vector<6x128xf32>
    %128 = arith.addf %126, %127 : vector<6x128xf32>
    %129 = vector.extract_strided_slice %5 {offsets = [0, 7936], sizes = [6, 128], strides = [1, 1]} : vector<6x9216xf32> to vector<6x128xf32>
    %130 = arith.addf %128, %129 : vector<6x128xf32>
    %131 = vector.extract_strided_slice %5 {offsets = [0, 8064], sizes = [6, 128], strides = [1, 1]} : vector<6x9216xf32> to vector<6x128xf32>
    %132 = arith.addf %130, %131 : vector<6x128xf32>
    %133 = vector.extract_strided_slice %5 {offsets = [0, 8192], sizes = [6, 128], strides = [1, 1]} : vector<6x9216xf32> to vector<6x128xf32>
    %134 = arith.addf %132, %133 : vector<6x128xf32>
    %135 = vector.extract_strided_slice %5 {offsets = [0, 8320], sizes = [6, 128], strides = [1, 1]} : vector<6x9216xf32> to vector<6x128xf32>
    %136 = arith.addf %134, %135 : vector<6x128xf32>
    %137 = vector.extract_strided_slice %5 {offsets = [0, 8448], sizes = [6, 128], strides = [1, 1]} : vector<6x9216xf32> to vector<6x128xf32>
    %138 = arith.addf %136, %137 : vector<6x128xf32>
    %139 = vector.extract_strided_slice %5 {offsets = [0, 8576], sizes = [6, 128], strides = [1, 1]} : vector<6x9216xf32> to vector<6x128xf32>
    %140 = arith.addf %138, %139 : vector<6x128xf32>
    %141 = vector.extract_strided_slice %5 {offsets = [0, 8704], sizes = [6, 128], strides = [1, 1]} : vector<6x9216xf32> to vector<6x128xf32>
    %142 = arith.addf %140, %141 : vector<6x128xf32>
    %143 = vector.extract_strided_slice %5 {offsets = [0, 8832], sizes = [6, 128], strides = [1, 1]} : vector<6x9216xf32> to vector<6x128xf32>
    %144 = arith.addf %142, %143 : vector<6x128xf32>
    %145 = vector.extract_strided_slice %5 {offsets = [0, 8960], sizes = [6, 128], strides = [1, 1]} : vector<6x9216xf32> to vector<6x128xf32>
    %146 = arith.addf %144, %145 : vector<6x128xf32>
    %147 = vector.extract_strided_slice %5 {offsets = [0, 9088], sizes = [6, 128], strides = [1, 1]} : vector<6x9216xf32> to vector<6x128xf32>
    %148 = arith.addf %146, %147 : vector<6x128xf32>
    %c0_4 = arith.constant 0 : index
    %c0_5 = arith.constant 0 : index
    %149 = vector.load %arg4[%c0_4, %c0_5] : memref<6x128xf32, #tpu.memory_space<vmem>>, vector<6x128xf32>
    %150 = arith.addf %149, %148 : vector<6x128xf32>
    %c0_6 = arith.constant 0 : index
    %c0_7 = arith.constant 0 : index
    %151 = vector.load %arg4[%c0_6, %c0_7] : memref<6x128xf32, #tpu.memory_space<vmem>>, vector<6x128xf32>
    tpu.vector_store %arg4[%c0_6, %c0_7], %150 {strides = array<i32>} : memref<6x128xf32, #tpu.memory_space<vmem>>, vector<6x128xf32>,
    %c0_i32_8 = arith.constant 0 : i32
    %152 = arith.cmpi eq, %arg0, %c0_i32_8 : i32
    %153 = arith.extui %152 : i1 to i32
    %c0_i32_9 = arith.constant 0 : i32
    %154 = arith.cmpi ne, %153, %c0_i32_9 : i32
    scf.if %154 {
      %c0_10 = arith.constant 0 : index
      %c0_11 = arith.constant 0 : index
      %155 = vector.load %arg4[%c0_10, %c0_11] : memref<6x128xf32, #tpu.memory_space<vmem>>, vector<6x128xf32>
      %cst = arith.constant dense<0.000000e+00> : vector<6xf32>
      %156 = vector.multi_reduction <add>, %155, %cst [1] : vector<6x128xf32> to vector<6xf32>
      %157 = vector.shape_cast %156 : vector<6xf32> to vector<6x1xf32>
      %cst_12 = arith.constant 5.42534726E-5 : f32
      %158 = vector.broadcast %cst_12 : f32 to vector<6x1xf32>
      %159 = arith.mulf %157, %158 : vector<6x1xf32>
      %160 = vector.shape_cast %159 : vector<6x1xf32> to vector<6x1xf32>
      %161 = vector.broadcast %160 : vector<6x1xf32> to vector<6x128xf32>
      %c0_13 = arith.constant 0 : index
      %c0_14 = arith.constant 0 : index
      %162 = vector.load %arg3[%c0_13, %c0_14] : memref<6x128xf32, #tpu.memory_space<vmem>>, vector<6x128xf32>
      tpu.vector_store %arg3[%c0_13, %c0_14], %161 {strides = array<i32>} : memref<6x128xf32, #tpu.memory_space<vmem>>, vector<6x128xf32>,
    } else {
    }
    return
  }
  func.func @transform_0(%arg0: i32) -> (i32, i32) {
    %c0_i32 = arith.constant 0 : i32
    %c0_i32_0 = arith.constant 0 : i32
    return %c0_i32, %arg0 : i32, i32
  }
  func.func @transform_1(%arg0: i32) -> (i32, i32) {
    %c0_i32 = arith.constant 0 : i32
    %c0_i32_0 = arith.constant 0 : i32
    return %c0_i32, %arg0 : i32, i32
  }
  func.func @transform_2(%arg0: i32) -> (i32, i32) {
    %c0_i32 = arith.constant 0 : i32
    %c0_i32_0 = arith.constant 0 : i32
    %c0_i32_1 = arith.constant 0 : i32
    return %c0_i32, %c0_i32_0 : i32, i32
  }
}

module attributes {stable_mosaic.version = 11 : i64} {
  func.func @_fused_head_kernel(%arg0: i32, %arg1: i32, %arg2: memref<128x192xf32, #tpu.memory_space<vmem>>, %arg3: memref<128x192xf32, #tpu.memory_space<vmem>>, %arg4: memref<192x192xf32, #tpu.memory_space<vmem>>, %arg5: memref<192x192xf32, #tpu.memory_space<vmem>>, %arg6: memref<1x1x192xf32, #tpu.memory_space<vmem>>, %arg7: memref<1x1x192xf32, #tpu.memory_space<vmem>>, %arg8: memref<128x192xf32, #tpu.memory_space<vmem>>) attributes {dimension_semantics = [#tpu.dimension_semantics<parallel>, #tpu.dimension_semantics<parallel>], iteration_bounds = array<i64: 2, 2>, scalar_prefetch = 0 : i64, scratch_operands = 0 : i64, tpu.core_type = #tpu.core_type<tc>, window_params = [{transform_indices = @transform_0, window_bounds = array<i64: 128, 192>}, {transform_indices = @transform_1, window_bounds = array<i64: 128, 192>}, {pipeline_mode = #tpu.pipeline_mode<synchronous>, transform_indices = @transform_2, window_bounds = array<i64: 192, 192>}, {pipeline_mode = #tpu.pipeline_mode<synchronous>, transform_indices = @transform_3, window_bounds = array<i64: 192, 192>}, {transform_indices = @transform_4, window_bounds = array<i64: 1, 1, 192>}, {transform_indices = @transform_5, window_bounds = array<i64: 1, 1, 192>}, {transform_indices = @transform_6, window_bounds = array<i64: 128, 192>}]} {
    %c0 = arith.constant 0 : index
    %c0_0 = arith.constant 0 : index
    %c0_1 = arith.constant 0 : index
    %0 = vector.load %arg6[%c0, %c0_0, %c0_1] : memref<1x1x192xf32, #tpu.memory_space<vmem>>, vector<1x1x192xf32>
    %1 = vector.shape_cast %0 : vector<1x1x192xf32> to vector<1x192xf32>
    %c0_2 = arith.constant 0 : index
    %c0_3 = arith.constant 0 : index
    %2 = vector.load %arg2[%c0_2, %c0_3] : memref<128x192xf32, #tpu.memory_space<vmem>>, vector<128x192xf32>
    %3 = vector.broadcast %1 : vector<1x192xf32> to vector<128x192xf32>
    %4 = arith.subf %2, %3 : vector<128x192xf32>
    %c0_4 = arith.constant 0 : index
    %c0_5 = arith.constant 0 : index
    %5 = vector.load %arg3[%c0_4, %c0_5] : memref<128x192xf32, #tpu.memory_space<vmem>>, vector<128x192xf32>
    %6 = vector.broadcast %1 : vector<1x192xf32> to vector<128x192xf32>
    %7 = arith.subf %5, %6 : vector<128x192xf32>
    %c0_6 = arith.constant 0 : index
    %c0_7 = arith.constant 0 : index
    %8 = vector.load %arg4[%c0_6, %c0_7] : memref<192x192xf32, #tpu.memory_space<vmem>>, vector<192x192xf32>
    %cst = arith.constant dense<0.000000e+00> : vector<128x192xf32>
    %9 = tpu.matmul %4, %8, %cst {dimension_numbers = #tpu.dot_dimension_numbers<[1], [0], [0], [1], [0, 0, 1, 1], [], []>} : vector<128x192xf32>, vector<192x192xf32>, vector<128x192xf32> -> vector<128x192xf32>
    %c0_8 = arith.constant 0 : index
    %c0_9 = arith.constant 0 : index
    %10 = vector.load %arg5[%c0_8, %c0_9] : memref<192x192xf32, #tpu.memory_space<vmem>>, vector<192x192xf32>
    %cst_10 = arith.constant dense<0.000000e+00> : vector<128x192xf32>
    %11 = tpu.matmul %7, %10, %cst_10 {dimension_numbers = #tpu.dot_dimension_numbers<[1], [0], [0], [1], [0, 0, 1, 1], [], []>} : vector<128x192xf32>, vector<192x192xf32>, vector<128x192xf32> -> vector<128x192xf32>
    %12 = arith.addf %9, %11 : vector<128x192xf32>
    %c0_11 = arith.constant 0 : index
    %c0_12 = arith.constant 0 : index
    %c0_13 = arith.constant 0 : index
    %13 = vector.load %arg7[%c0_11, %c0_12, %c0_13] : memref<1x1x192xf32, #tpu.memory_space<vmem>>, vector<1x1x192xf32>
    %14 = vector.shape_cast %13 : vector<1x1x192xf32> to vector<1x192xf32>
    %15 = vector.broadcast %14 : vector<1x192xf32> to vector<128x192xf32>
    %16 = arith.addf %12, %15 : vector<128x192xf32>
    %c0_14 = arith.constant 0 : index
    %c0_15 = arith.constant 0 : index
    %17 = vector.load %arg8[%c0_14, %c0_15] : memref<128x192xf32, #tpu.memory_space<vmem>>, vector<128x192xf32>
    tpu.vector_store %arg8[%c0_14, %c0_15], %16 {strides = array<i32>} : memref<128x192xf32, #tpu.memory_space<vmem>>, vector<128x192xf32>,
    return
  }
  func.func @transform_0(%arg0: i32, %arg1: i32) -> (i32, i32) {
    %c2_i32 = arith.constant 2 : i32
    %0 = arith.muli %arg0, %c2_i32 : i32
    %1 = arith.addi %0, %arg1 : i32
    %c0_i32 = arith.constant 0 : i32
    %c0_i32_0 = arith.constant 0 : i32
    return %1, %c0_i32 : i32, i32
  }
  func.func @transform_1(%arg0: i32, %arg1: i32) -> (i32, i32) {
    %c2_i32 = arith.constant 2 : i32
    %0 = arith.muli %arg0, %c2_i32 : i32
    %1 = arith.addi %0, %arg1 : i32
    %c0_i32 = arith.constant 0 : i32
    %c0_i32_0 = arith.constant 0 : i32
    return %1, %c0_i32 : i32, i32
  }
  func.func @transform_2(%arg0: i32, %arg1: i32) -> (i32, i32) {
    %c0_i32 = arith.constant 0 : i32
    %c0_i32_0 = arith.constant 0 : i32
    %c0_i32_1 = arith.constant 0 : i32
    return %c0_i32, %c0_i32_0 : i32, i32
  }
  func.func @transform_3(%arg0: i32, %arg1: i32) -> (i32, i32) {
    %c0_i32 = arith.constant 0 : i32
    %c0_i32_0 = arith.constant 0 : i32
    %c0_i32_1 = arith.constant 0 : i32
    return %c0_i32, %c0_i32_0 : i32, i32
  }
  func.func @transform_4(%arg0: i32, %arg1: i32) -> (i32, i32, i32) {
    %c0_i32 = arith.constant 0 : i32
    %c0_i32_0 = arith.constant 0 : i32
    %c0_i32_1 = arith.constant 0 : i32
    return %arg0, %c0_i32, %c0_i32_0 : i32, i32, i32
  }
  func.func @transform_5(%arg0: i32, %arg1: i32) -> (i32, i32, i32) {
    %c0_i32 = arith.constant 0 : i32
    %c0_i32_0 = arith.constant 0 : i32
    %c0_i32_1 = arith.constant 0 : i32
    return %arg0, %c0_i32, %c0_i32_0 : i32, i32, i32
  }
  func.func @transform_6(%arg0: i32, %arg1: i32) -> (i32, i32) {
    %c2_i32 = arith.constant 2 : i32
    %0 = arith.muli %arg0, %c2_i32 : i32
    %1 = arith.addi %0, %arg1 : i32
    %c0_i32 = arith.constant 0 : i32
    %c0_i32_0 = arith.constant 0 : i32
    return %1, %c0_i32 : i32, i32
  }
}

</mosaic_0001>

<bundles_post_ra>
// kernel: tain_forward.2
= control target key start
LH: loop header
LB: loop body
LE: loop exit
PB: predicated region body
PF: predicated region fallthrough
CT: control target
= control target key end

     0   :  { %v321_v0 = vmov 0.0   ;;  %vm310_vm0 = vcmask 1045504   ;;  %s889_s0 = inlined_call_operand.vmem [shape: f32[6,9216], index: 0, kind: input, shape index: {}]   ;;  %s890_s1 = inlined_call_operand.vmem [shape: f32[6,9216], index: 1, kind: input, shape index: {}]   ;;  %s891_s2 = inlined_call_operand.vmem [shape: f32[6,128], index: 2, kind: output, shape index: {}]  }
   0x1   :  { %15 = vst [vmem:[#allocation2] sm:$0x3f] %v321_v0  ;;  %v16_v1 = vld [vmem:[%s889_s0] sm:$0x3f]  ;;  %v17_v2 = vld [vmem:[%s889_s0 + $0x8] sm:$0x3f] }
   0x2   :  { %v18_v3 = vld [vmem:[%s889_s0 + $0x10] sm:$0x3f]  ;;  %v19_v4 = vld [vmem:[%s889_s0 + $0x18] sm:$0x3f]  ;;  %v88_v5 = vld [vmem:[%s890_s1] sm:$0x3f] }
   0x3   :  { %v89_v6 = vld [vmem:[%s890_s1 + $0x8] sm:$0x3f]  ;;  %v90_v7 = vld [vmem:[%s890_s1 + $0x10] sm:$0x3f]  ;;  %v91_v8 = vld [vmem:[%s890_s1 + $0x18] sm:$0x3f]  ;;  %v160_v9 = vadd.f32 %v88_v5, %v16_v1 }
   0x4   :  { %v161_v10 = vadd.f32 %v89_v6, %v17_v2  ;;  %v20_v11 = vld [vmem:[%s889_s0 + $0x20] sm:$0x3f]  ;;  %v162_v13 = vadd.f32 %v90_v7, %v18_v3  ;;  %v163_v14 = vadd.f32 %v91_v8, %v19_v4  ;;  %v21_v16 = vld [vmem:[%s889_s0 + $0x28] sm:$0x3f]  ;;  %v22_v20 = vld [vmem:[%s889_s0 + $0x30] sm:$0x3f] }
   0x5   :  { %v92_v12 = vld [vmem:[%s890_s1 + $0x20] sm:$0x3f]  ;;  %v93_v17 = vld [vmem:[%s890_s1 + $0x28] sm:$0x3f]  ;;  %v23_v21 = vld [vmem:[%s889_s0 + $0x38] sm:$0x3f] }
   0x6   :  { %v232_v15 = vadd.f32 %v161_v10, %v160_v9  ;;  %v164_v18 = vadd.f32 %v92_v12, %v20_v11  ;;  %v94_v22 = vld [vmem:[%s890_s1 + $0x30] sm:$0x3f]  ;;  %v24_v23 = vld [vmem:[%s889_s0 + $0x40] sm:$0x3f]  ;;  %v49_v24 = vld [vmem:[%s889_s0 + $0x108] sm:$0x3f]  ;;  %v165_v26 = vadd.f32 %v93_v17, %v21_v16 }
   0x7   :  { %v50_v25 = vld [vmem:[%s889_s0 + $0x110] sm:$0x3f]  ;;  %v51_v28 = vld [vmem:[%s889_s0 + $0x118] sm:$0x3f]  ;;  %v52_v29 = vld [vmem:[%s889_s0 + $0x120] sm:$0x3f]  ;;  %v166_v37 = vadd.f32 %v94_v22, %v22_v20 }
   0x8   :  { %v233_v19 = vadd.f32 %v232_v15, %v162_v13  ;;  %v53_v30 = vld [vmem:[%s889_s0 + $0x128] sm:$0x3f]  ;;  %v95_v31 = vld [vmem:[%s890_s1 + $0x38] sm:$0x3f]  ;;  %v54_v33 = vld [vmem:[%s889_s0 + $0x130] sm:$0x3f] }
   0x9   :  { %v25_v32 = vld [vmem:[%s889_s0 + $0x48] sm:$0x3f]  ;;  %v55_v34 = vld [vmem:[%s889_s0 + $0x138] sm:$0x3f]  ;;  %v56_v35 = vld [vmem:[%s889_s0 + $0x140] sm:$0x3f]  ;;  %v167_v50 = vadd.f32 %v95_v31, %v23_v21 }
   0xa   :  { %v234_v27 = vadd.f32 %v233_v19, %v163_v14  ;;  %v96_v36 = vld [vmem:[%s890_s1 + $0x40] sm:$0x3f]  ;;  %v57_v39 = vld [vmem:[%s889_s0 + $0x148] sm:$0x3f]  ;;  %v58_v40 = vld [vmem:[%s889_s0 + $0x150] sm:$0x3f] }
   0xb   :  { %v59_v41 = vld [vmem:[%s889_s0 + $0x158] sm:$0x3f]  ;;  %v97_v42 = vld [vmem:[%s890_s1 + $0x48] sm:$0x3f]  ;;  %v26_v43 = vld [vmem:[%s889_s0 + $0x50] sm:$0x3f]  ;;  %v168_v58 = vadd.f32 %v96_v36, %v24_v23 }
   0xc   :  { %v235_v38 = vadd.f32 %v234_v27, %v164_v18  ;;  %v60_v44 = vld [vmem:[%s889_s0 + $0x160] sm:$0x3f]  ;;  %v61_v45 = vld [vmem:[%s889_s0 + $0x168] sm:$0x3f]  ;;  %v62_v46 = vld [vmem:[%s889_s0 + $0x170] sm:$0x3f]  ;;  %v169_v15 = vadd.f32 %v97_v42, %v25_v32 }
   0xd   :  { %v98_v47 = vld [vmem:[%s890_s1 + $0x50] sm:$0x3f]  ;;  %v121_v48 = vld [vmem:[%s890_s1 + $0x108] sm:$0x3f]  ;;  %v63_v52 = vld [vmem:[%s889_s0 + $0x178] sm:$0x3f] }
   0xe   :  { %v122_v49 = vld [vmem:[%s890_s1 + $0x110] sm:$0x3f]  ;;  %v236_v51 = vadd.f32 %v235_v38, %v165_v26  ;;  %v64_v53 = vld [vmem:[%s889_s0 + $0x180] sm:$0x3f]  ;;  %v65_v54 = vld [vmem:[%s889_s0 + $0x188] sm:$0x3f]  ;;  %v469_v59 = vadd.f32 %v121_v48, %v49_v24 }
   0xf   :  { %v123_v55 = vld [vmem:[%s890_s1 + $0x118] sm:$0x3f]  ;;  %v124_v56 = vld [vmem:[%s890_s1 + $0x120] sm:$0x3f]  ;;  %v125_v57 = vld [vmem:[%s890_s1 + $0x128] sm:$0x3f]  ;;  %v471_v60 = vadd.f32 %v122_v49, %v50_v25 }
  0x10   :  { %v27_v61 = vld [vmem:[%s889_s0 + $0x58] sm:$0x3f]  ;;  %v66_v62 = vld [vmem:[%s889_s0 + $0x190] sm:$0x3f]  ;;  %v68_v0 = vld [vmem:[%s889_s0 + $0x1a0] sm:$0x3f]  ;;  %v497_v5 = vadd.f32 %v123_v55, %v51_v28  ;;  %v499_v6 = vadd.f32 %v124_v56, %v52_v29  ;;  %v501_v7 = vadd.f32 %v125_v57, %v53_v30  ;;  %v237_v8 = vadd.f32 %v236_v51, %v166_v37 }
  0x11   :  { %v67_v63 = vld [vmem:[%s889_s0 + $0x198] sm:$0x3f]  ;;  %v126_v2 = vld [vmem:[%s890_s1 + $0x130] sm:$0x3f]  ;;  %v128_v4 = vld [vmem:[%s890_s1 + $0x140] sm:$0x3f]  ;;  %v170_v37 = vadd.f32 %v98_v47, %v26_v43 }
  0x12   :  { %v99_v1 = vld [vmem:[%s890_s1 + $0x58] sm:$0x3f]  ;;  %v69_v9 = vld [vmem:[%s889_s0 + $0x1a8] sm:$0x3f]  ;;  %v70_v10 = vld [vmem:[%s889_s0 + $0x1b0] sm:$0x3f]  ;;  %v521_v16 = vadd.f32 %v126_v2, %v54_v33  ;;  %v525_v18 = vadd.f32 %v128_v4, %v56_v35  ;;  %v238_v30 = vadd.f32 %v237_v8, %v167_v50 }
  0x13   :  { %v127_v3 = vld [vmem:[%s890_s1 + $0x138] sm:$0x3f]  ;;  %v129_v12 = vld [vmem:[%s890_s1 + $0x148] sm:$0x3f]  ;;  %v130_v13 = vld [vmem:[%s890_s1 + $0x150] sm:$0x3f] }
  0x14   :  { %v71_v11 = vld [vmem:[%s889_s0 + $0x1b8] sm:$0x3f]  ;;  %v523_v17 = vadd.f32 %v127_v3, %v55_v34  ;;  %v28_v19 = vld [vmem:[%s889_s0 + $0x60] sm:$0x3f]  ;;  %v73_v21 = vld [vmem:[%s889_s0 + $0x1c8] sm:$0x3f]  ;;  %v551_v27 = vadd.f32 %v129_v12, %v57_v39  ;;  %v553_v28 = vadd.f32 %v130_v13, %v58_v40  ;;  %v239_v55 = vadd.f32 %v238_v30, %v168_v58 }
  0x15   :  { %v131_v14 = vld [vmem:[%s890_s1 + $0x158] sm:$0x3f]  ;;  %v72_v20 = vld [vmem:[%s889_s0 + $0x1c0] sm:$0x3f]  ;;  %v74_v22 = vld [vmem:[%s889_s0 + $0x1d0] sm:$0x3f]  ;;  %v171_v58 = vadd.f32 %v99_v1, %v27_v61 }
  0x16   :  { %v100_v23 = vld [vmem:[%s890_s1 + $0x60] sm:$0x3f]  ;;  %v133_v25 = vld [vmem:[%s890_s1 + $0x168] sm:$0x3f]  ;;  %v134_v26 = vld [vmem:[%s890_s1 + $0x170] sm:$0x3f]  ;;  %v555_v29 = vadd.f32 %v131_v14, %v59_v41 }
  0x17   :  { %v132_v24 = vld [vmem:[%s890_s1 + $0x160] sm:$0x3f]  ;;  %v75_v31 = vld [vmem:[%s889_s0 + $0x1d8] sm:$0x3f]  ;;  %v77_v33 = vld [vmem:[%s889_s0 + $0x1e8] sm:$0x3f]  ;;  %v577_v39 = vadd.f32 %v133_v25, %v61_v45  ;;  %v579_v40 = vadd.f32 %v134_v26, %v62_v46  ;;  %v240_v25 = vadd.f32 %v239_v55, %v169_v15  ;;  %v172_v15 = vadd.f32 %v100_v23, %v28_v19 }
  0x18   :  { %v76_v32 = vld [vmem:[%s889_s0 + $0x1e0] sm:$0x3f]  ;;  %v135_v34 = vld [vmem:[%s890_s1 + $0x178] sm:$0x3f]  ;;  %v137_v36 = vld [vmem:[%s890_s1 + $0x188] sm:$0x3f]  ;;  %v575_v38 = vadd.f32 %v132_v24, %v60_v44 }
  0x19   :  { %v136_v35 = vld [vmem:[%s890_s1 + $0x180] sm:$0x3f]  ;;  %v29_v41 = vld [vmem:[%s889_s0 + $0x68] sm:$0x3f]  ;;  %v78_v42 = vld [vmem:[%s889_s0 + $0x1f0] sm:$0x3f]  ;;  %v605_v49 = vadd.f32 %v135_v34, %v63_v52  ;;  %v609_v51 = vadd.f32 %v137_v36, %v65_v54 }
  0x1a   :  { %v79_v48 = vld [vmem:[%s889_s0 + $0x1f8] sm:$0x3f]  ;;  %v80_v43 = vld [vmem:[%s889_s0 + $0x200] sm:$0x3f]  ;;  %v101_v44 = vld [vmem:[%s890_s1 + $0x68] sm:$0x3f]  ;;  %v607_v50 = vadd.f32 %v136_v35, %v64_v53 }
  0x1b   :  { %v138_v45 = vld [vmem:[%s890_s1 + $0x190] sm:$0x3f]  ;;  %v139_v46 = vld [vmem:[%s890_s1 + $0x198] sm:$0x3f]  ;;  %v140_v47 = vld [vmem:[%s890_s1 + $0x1a0] sm:$0x3f] }
  0x1c   :  { %v81_v56 = vld [vmem:[%s889_s0 + $0x208] sm:$0x3f]  ;;  %v82_v57 = vld [vmem:[%s889_s0 + $0x210] sm:$0x3f]  ;;  %v83_v2 = vld [vmem:[%s889_s0 + $0x218] sm:$0x3f]  ;;  %v629_v3 = vadd.f32 %v138_v45, %v66_v62  ;;  %v631_v4 = vadd.f32 %v139_v46, %v67_v63  ;;  %v633_v8 = vadd.f32 %v140_v47, %v68_v0 }
  0x1d   :  { %v141_v52 = vld [vmem:[%s890_s1 + $0x1a8] sm:$0x3f]  ;;  %v142_v53 = vld [vmem:[%s890_s1 + $0x1b0] sm:$0x3f]  ;;  %v143_v54 = vld [vmem:[%s890_s1 + $0x1b8] sm:$0x3f] }
  0x1e   :  { %v84_v12 = vld [vmem:[%s889_s0 + $0x220] sm:$0x3f]  ;;  %v85_v13 = vld [vmem:[%s889_s0 + $0x228] sm:$0x3f]  ;;  %v86_v14 = vld [vmem:[%s889_s0 + $0x230] sm:$0x3f]  ;;  %v653_v0 = vadd.f32 %v141_v52, %v69_v9  ;;  %v655_v1 = vadd.f32 %v142_v53, %v70_v10  ;;  %v657_v24 = vadd.f32 %v143_v54, %v71_v11  ;;  %v173_v54 = vadd.f32 %v101_v44, %v29_v41 }
  0x1f   :  { %v144_v61 = vld [vmem:[%s890_s1 + $0x1c0] sm:$0x3f]  ;;  %v145_v62 = vld [vmem:[%s890_s1 + $0x1c8] sm:$0x3f]  ;;  %v146_v63 = vld [vmem:[%s890_s1 + $0x1d0] sm:$0x3f] }
  0x20   :  { %v30_v26 = vld [vmem:[%s889_s0 + $0x70] sm:$0x3f]  ;;  %v87_v30 = vld [vmem:[%s889_s0 + $0x238] sm:$0x3f]  ;;  %v148_v10 = vld [vmem:[%s890_s1 + $0x1e0] sm:$0x3f]  ;;  %v677_v35 = vadd.f32 %v144_v61, %v72_v20  ;;  %v679_v36 = vadd.f32 %v145_v62, %v73_v21  ;;  %v681_v45 = vadd.f32 %v146_v63, %v74_v22  ;;  %v241_v21 = vadd.f32 %v240_v25, %v170_v37 }
  0x21   :  { %v102_v34 = vld [vmem:[%s890_s1 + $0x70] sm:$0x3f]  ;;  %v147_v9 = vld [vmem:[%s890_s1 + $0x1d8] sm:$0x3f]  ;;  %v149_v11 = vld [vmem:[%s890_s1 + $0x1e8] sm:$0x3f]  ;;  %v694_v19 = vadd.f32 %v148_v10, %v76_v32 }
  0x22   :  { %v150_v46 = vld [vmem:[%s890_s1 + $0x1f0] sm:$0x3f]  ;;  %v151_v47 = vld [vmem:[%s890_s1 + $0x1f8] sm:$0x3f]  ;;  %v152_v55 = vld [vmem:[%s890_s1 + $0x200] sm:$0x3f]  ;;  %v692_v52 = vadd.f32 %v147_v9, %v75_v31  ;;  %v696_v20 = vadd.f32 %v149_v11, %v77_v33 }
  0x23   :  { %v153_v22 = vld [vmem:[%s890_s1 + $0x208] sm:$0x3f]  ;;  %v154_v23 = vld [vmem:[%s890_s1 + $0x210] sm:$0x3f]  ;;  %v155_v53 = vld [vmem:[%s890_s1 + $0x218] sm:$0x3f]  ;;  %v707_v31 = vadd.f32 %v150_v46, %v78_v42  ;;  %v709_v32 = vadd.f32 %v151_v47, %v79_v48  ;;  %v711_v33 = vadd.f32 %v152_v55, %v80_v43  ;;  %v242_v48 = vadd.f32 %v241_v21, %v171_v58 }
  0x24   :  { %v156_v37 = vld [vmem:[%s890_s1 + $0x220] sm:$0x3f]  ;;  %v157_v61 = vld [vmem:[%s890_s1 + $0x228] sm:$0x3f]  ;;  %v158_v62 = vld [vmem:[%s890_s1 + $0x230] sm:$0x3f]  ;;  %v722_v63 = vadd.f32 %v153_v22, %v81_v56  ;;  %v724_v41 = vadd.f32 %v154_v23, %v82_v57  ;;  %v726_v42 = vadd.f32 %v155_v53, %v83_v2  ;;  %v174_v2 = vadd.f32 %v102_v34, %v30_v26 }
  0x25   :  { %v31_v43 = vld [vmem:[%s889_s0 + $0x78] sm:$0x3f]  ;;  %v737_v9 = vadd.f32 %v156_v37, %v84_v12  ;;  %v739_v56 = vadd.f32 %v157_v61, %v85_v13  ;;  %v741_v57 = vadd.f32 %v158_v62, %v86_v14  ;;  %v243_v10 = vadd.f32 %v242_v48, %v172_v15  ;;  %v32_v11 = vld [vmem:[%s889_s0 + $0x80] sm:$0x3f]  ;;  %v33_v12 = vld [vmem:[%s889_s0 + $0x88] sm:$0x3f] }
  0x26   :  { %v103_v44 = vld [vmem:[%s890_s1 + $0x78] sm:$0x3f]  ;;  %v104_v46 = vld [vmem:[%s890_s1 + $0x80] sm:$0x3f]  ;;  %v105_v13 = vld [vmem:[%s890_s1 + $0x88] sm:$0x3f] }
  0x27   :  { %v159_v25 = vld [vmem:[%s890_s1 + $0x238] sm:$0x3f]  ;;  %v175_v47 = vadd.f32 %v103_v44, %v31_v43  ;;  %v244_v55 = vadd.f32 %v243_v10, %v173_v54  ;;  %v176_v14 = vadd.f32 %v104_v46, %v32_v11  ;;  %v106_v34 = vld [vmem:[%s890_s1 + $0x90] sm:$0x3f]  ;;  %v177_v15 = vadd.f32 %v105_v13, %v33_v12  ;;  %v36_v37 = vld [vmem:[%s889_s0 + $0xa0] sm:$0x3f] }
  0x28   :  { %v743_v58 = vadd.f32 %v159_v25, %v87_v30  ;;  %v34_v30 = vld [vmem:[%s889_s0 + $0x90] sm:$0x3f]  ;;  %v35_v22 = vld [vmem:[%s889_s0 + $0x98] sm:$0x3f]  ;;  %v108_v61 = vld [vmem:[%s890_s1 + $0xa0] sm:$0x3f] }
  0x29   :  { %v245_v26 = vadd.f32 %v244_v55, %v174_v2  ;;  %v107_v23 = vld [vmem:[%s890_s1 + $0x98] sm:$0x3f]  ;;  %v178_v53 = vadd.f32 %v106_v34, %v34_v30  ;;  %v37_v43 = vld [vmem:[%s889_s0 + $0xa8] sm:$0x3f]  ;;  %v180_v25 = vadd.f32 %v108_v61, %v36_v37  ;;  %v38_v10 = vld [vmem:[%s889_s0 + $0xb0] sm:$0x3f] }
  0x2a   :  { %v179_v62 = vadd.f32 %v107_v23, %v35_v22  ;;  %v109_v44 = vld [vmem:[%s890_s1 + $0xa8] sm:$0x3f]  ;;  %v110_v11 = vld [vmem:[%s890_s1 + $0xb0] sm:$0x3f]  ;;  %v39_v55 = vld [vmem:[%s889_s0 + $0xb8] sm:$0x3f] }
  0x2b   :  { %v246_v21 = vadd.f32 %v245_v26, %v175_v47  ;;  %v181_v46 = vadd.f32 %v109_v44, %v37_v43  ;;  %v111_v12 = vld [vmem:[%s890_s1 + $0xb8] sm:$0x3f]  ;;  %v182_v13 = vadd.f32 %v110_v11, %v38_v10  ;;  %v40_v26 = vld [vmem:[%s889_s0 + $0xc0] sm:$0x3f]  ;;  %v113_v22 = vld [vmem:[%s890_s1 + $0xc8] sm:$0x3f] }
  0x2c   :  { %v112_v30 = vld [vmem:[%s890_s1 + $0xc0] sm:$0x3f]  ;;  %v183_v34 = vadd.f32 %v111_v12, %v39_v55  ;;  %v114_v37 = vld [vmem:[%s890_s1 + $0xd0] sm:$0x3f]  ;;  %v115_v43 = vld [vmem:[%s890_s1 + $0xd8] sm:$0x3f] }
  0x2d   :  { %v247_v54 = vadd.f32 %v246_v21, %v176_v14  ;;  %v41_v21 = vld [vmem:[%s889_s0 + $0xc8] sm:$0x3f]  ;;  %v184_v23 = vadd.f32 %v112_v30, %v40_v26  ;;  %v116_v10 = vld [vmem:[%s890_s1 + $0xe0] sm:$0x3f]  ;;  %v118_v26 = vld [vmem:[%s890_s1 + $0xf0] sm:$0x3f] }
  0x2e   :  { %v185_v61 = vadd.f32 %v113_v22, %v41_v21  ;;  %v117_v55 = vld [vmem:[%s890_s1 + $0xe8] sm:$0x3f]  ;;  %v119_v21 = vld [vmem:[%s890_s1 + $0xf8] sm:$0x3f] }
  0x2f   :  { %v248_v48 = vadd.f32 %v247_v54, %v177_v15  ;;  %v42_v54 = vld [vmem:[%s889_s0 + $0xd0] sm:$0x3f] }
  0x30   :  { %v186_v44 = vadd.f32 %v114_v37, %v42_v54  ;;  %v120_v54 = vld [vmem:[%s890_s1 + $0x100] sm:$0x3f] }
  0x31   :  { %v249_v2 = vadd.f32 %v248_v48, %v178_v53  ;;  %v43_v48 = vld [vmem:[%s889_s0 + $0xd8] sm:$0x3f] }
  0x32   :  { %v187_v11 = vadd.f32 %v115_v43, %v43_v48 }
  0x33   :  { %v250_v47 = vadd.f32 %v249_v2, %v179_v62  ;;  %v44_v2 = vld [vmem:[%s889_s0 + $0xe0] sm:$0x3f] }
  0x34   :  { %v188_v12 = vadd.f32 %v116_v10, %v44_v2 }
  0x35   :  { %v251_v14 = vadd.f32 %v250_v47, %v180_v25  ;;  %v45_v47 = vld [vmem:[%s889_s0 + $0xe8] sm:$0x3f] }
  0x36   :  { %v189_v30 = vadd.f32 %v117_v55, %v45_v47 }
  0x37   :  { %v252_v15 = vadd.f32 %v251_v14, %v181_v46  ;;  %v46_v14 = vld [vmem:[%s889_s0 + $0xf0] sm:$0x3f] }
  0x38   :  { %v190_v22 = vadd.f32 %v118_v26, %v46_v14  ;;  %v303_v26 = vld [vmem:[#allocation2] sm:$0x3f] }
  0x39   :  { %v253_v53 = vadd.f32 %v252_v15, %v182_v13  ;;  %v47_v15 = vld [vmem:[%s889_s0 + $0xf8] sm:$0x3f] }
  0x3a   :  { %v191_v37 = vadd.f32 %v119_v21, %v47_v15 }
  0x3b   :  { %v254_v62 = vadd.f32 %v253_v53, %v183_v34  ;;  %v48_v53 = vld [vmem:[%s889_s0 + $0x100] sm:$0x3f] }
  0x3d   :  { %v255_v25 = vadd.f32 %v254_v62, %v184_v23  ;;  %v192_v62 = vadd.f32 %v120_v54, %v48_v53 }
  0x3f   :  { %v256_v46 = vadd.f32 %v255_v25, %v185_v61 }
  0x41   :  { %v257_v13 = vadd.f32 %v256_v46, %v186_v44 }
  0x43   :  { %v258_v34 = vadd.f32 %v257_v13, %v187_v11 }
  0x45   :  { %v259_v23 = vadd.f32 %v258_v34, %v188_v12 }
  0x47   :  { %v260_v61 = vadd.f32 %v259_v23, %v189_v30 }
  0x49   :  { %v261_v48 = vadd.f32 %v260_v61, %v190_v22 }
  0x4b   :  { %v262_v43 = vadd.f32 %v261_v48, %v191_v37 }
  0x4d   :  { %v263_v44 = vadd.f32 %v262_v43, %v192_v62 }
  0x4f   :  { %v264_v25 = vadd.f32 %v263_v44, %v469_v59 }
  0x51   :  { %v265_v2 = vadd.f32 %v264_v25, %v471_v60 }
  0x53   :  { %v266_v10 = vadd.f32 %v265_v2, %v497_v5 }
  0x55   :  { %v267_v11 = vadd.f32 %v266_v10, %v499_v6 }
  0x57   :  { %v268_v46 = vadd.f32 %v267_v11, %v501_v7 }
  0x59   :  { %v269_v47 = vadd.f32 %v268_v46, %v521_v16 }
  0x5b   :  { %v270_v55 = vadd.f32 %v269_v47, %v523_v17 }
  0x5d   :  { %v271_v12 = vadd.f32 %v270_v55, %v525_v18 }
  0x5f   :  { %v272_v13 = vadd.f32 %v271_v12, %v551_v27 }
  0x61   :  { %v273_v14 = vadd.f32 %v272_v13, %v553_v28 }
  0x63   :  { %v274_v59 = vadd.f32 %v273_v14, %v555_v29 }
  0x65   :  { %v275_v60 = vadd.f32 %v274_v59, %v575_v38 }
  0x67   :  { %v276_v5 = vadd.f32 %v275_v60, %v577_v39 }
  0x69   :  { %v277_v6 = vadd.f32 %v276_v5, %v579_v40 }
  0x6b   :  { %v278_v7 = vadd.f32 %v277_v6, %v605_v49 }
  0x6d   :  { %v279_v16 = vadd.f32 %v278_v7, %v607_v50 }
  0x6f   :  { %v280_v17 = vadd.f32 %v279_v16, %v609_v51 }
  0x71   :  { %v281_v18 = vadd.f32 %v280_v17, %v629_v3 }
  0x73   :  { %v282_v27 = vadd.f32 %v281_v18, %v631_v4 }
  0x75   :  { %v283_v28 = vadd.f32 %v282_v27, %v633_v8 }
  0x77   :  { %v284_v29 = vadd.f32 %v283_v28, %v653_v0 }
  0x79   :  { %v285_v38 = vadd.f32 %v284_v29, %v655_v1 }
  0x7b   :  { %v286_v39 = vadd.f32 %v285_v38, %v657_v24 }
  0x7d   :  { %v287_v40 = vadd.f32 %v286_v39, %v677_v35 }
  0x7f   :  { %v288_v49 = vadd.f32 %v287_v40, %v679_v36 }
  0x81   :  { %v289_v50 = vadd.f32 %v288_v49, %v681_v45 }
  0x83   :  { %v290_v51 = vadd.f32 %v289_v50, %v692_v52 }
  0x85   :  { %v291_v3 = vadd.f32 %v290_v51, %v694_v19 }
  0x87   :  { %v292_v4 = vadd.f32 %v291_v3, %v696_v20 }
  0x89   :  { %v293_v8 = vadd.f32 %v292_v4, %v707_v31 }
  0x8b   :  { %v294_v0 = vadd.f32 %v293_v8, %v709_v32 }
  0x8d   :  { %v295_v1 = vadd.f32 %v294_v0, %v711_v33 }
  0x8f   :  { %v296_v24 = vadd.f32 %v295_v1, %v722_v63 }
  0x91   :  { %v297_v35 = vadd.f32 %v296_v24, %v724_v41 }
  0x93   :  { %v298_v36 = vadd.f32 %v297_v35, %v726_v42 }
  0x95   :  { %v299_v45 = vadd.f32 %v298_v36, %v737_v9 }
  0x97   :  { %v300_v52 = vadd.f32 %v299_v45, %v739_v56 }
  0x99   :  { %v301_v19 = vadd.f32 %v300_v52, %v741_v57 }
  0x9b   :  { %v302_v20 = vadd.f32 %v301_v19, %v743_v58 }
  0x9d   :  { %v304_v31 = vadd.f32 %v303_v26, %v302_v20 }
  0x9f   :  { %305 = vst [vmem:[#allocation2] sm:$0x3f] %v304_v31 }
  0xa6   :  { %v309_v32 = vld [vmem:[#allocation2] sm:$0x3f] }
  0xa7   :  { %v311_v33 = vsel %vm310_vm0, %v309_v32, 0.0 }
  0xa8   :  { %312 = vadd.xlane.f32.xlu0 %v311_v33 }
 0x11b   :  { %v313_v63 = vpop.xlane.xlu0 %312 }
 0x11c   :  { %v314_v30 = vmul.f32 5.4253473e-05, %v313_v63 }
 0x11e   :  { %315 = vst [vmem:[%s891_s2] sm:$0x3f] %v314_v30 }

// kernel: squeeze.1
= control target key start
LH: loop header
LB: loop body
LE: loop exit
PB: predicated region body
PF: predicated region fallthrough
CT: control target
= control target key end

     0   :  { %vm7_vm0 = vcmask 23552   ;;  %s39_s0 = inlined_call_operand.vmem [shape: f32[6], index: 0, kind: input, shape index: {}]   ;;  %s40_s1 = inlined_call_operand.vmem [shape: f32[2,3], index: 1, kind: output, shape index: {}]  }
   0x1   :  { %v4_v0 = vld [vmem:[%s39_s0] sm:$0x1]  ;;  %s22_s0 = smov 125  }
   0x2   :  { %5 = vst [vmem:[#allocation1] sm:$0x1] %v4_v0 }
   0x9   :  { %v9_v1 = vld [vmem:[#allocation1] sm:$0x1]  }
   0xa   :  { %v6_v2 = vld [vmem:[#allocation1] sm:$0x1]   ;;  %10 = vrot.lane.b32.xlu0 %v9_v1, %s22_s0 }
   0xb   :  { %8 = vst.msk [vmem:[#allocation0] sm:$0x1] %vm7_vm0, %v6_v2  }
  0x7c   :  { %v11_v3 = vpop.permute.xlu0 %10  }
  0x7d   :  { %14 = vst.msk [vmem:[#allocation0 + $0x1] sm:$0x1] %vm7_vm0, %v11_v3  }
  0x84   :  { %v17_v4 = vld [vmem:[#allocation0] sm:$0x3] }
  0x85   :  { %20 = vst [vmem:[%s40_s1] sm:$0x3] %v17_v4 }

// kernel: tain_forward.3
= control target key start
LH: loop header
LB: loop body
LE: loop exit
PB: predicated region body
PF: predicated region fallthrough
CT: control target
= control target key end

     0   :  { %s1631_s21 = smov 0   ;;  %s1633_s22 = smov 0   ;;  %s2477_s0 = inlined_call_operand.vmem [shape: f32[512,192], index: 0, kind: input, shape index: {}]   ;;  %s2478_s1 = inlined_call_operand.vmem [shape: f32[512,192], index: 1, kind: input, shape index: {}]   ;;  %s2479_s2 = inlined_call_operand.vmem [shape: f32[192,192], index: 2, kind: input, shape index: {}]   ;;  %s2480_s3 = inlined_call_operand.vmem [shape: f32[192,192], index: 3, kind: input, shape index: {}]   ;;  %s2481_s4 = inlined_call_operand.vmem [shape: f32[2,1,192], index: 4, kind: input, shape index: {}]   ;;  %s2482_s5 = inlined_call_operand.vmem [shape: f32[2,1,192], index: 5, kind: input, shape index: {}]   ;;  %s2483_s6 = inlined_call_operand.vmem [shape: f32[512,192], index: 6, kind: output, shape index: {}]  }
   0x1   :  { %s1635_s23 = smov 0   ;;  %s1637_s24 = smov 0  }
   0x2   :  { %s1639_s25 = smov 0  }
   0x3 LB: > { %s25_s26 = sadd.s32 1, %s1586_s23  ;;  %s28_s27 = sadd.s32 1, %s1590_s24  ;;  %s1594_s25 = sphi %s1639_s25, %s16_s25   ;;  %s1590_s24 = sphi %s1637_s24, %s2487_s24   ;;  %s1586_s23 = sphi %s1635_s23, %s2486_s23   ;;  %s1582_s22 = sphi %s1633_s22, %s2485_s22   ;;  %s1578_s21 = sphi %s1631_s21, %s2484_s21  }
   0x4   : > { %p26_p0 = scmp.ge.s32.totalorder %s25_s26, 2  ;;  %p1408_p1 = scmp.ge.s32.totalorder %s1594_s25, 1 }
   0x5   : > { %p276_p2 = scmp.lt.s32.totalorder %s1594_s25, 5 }
   0x6   : > { %s2489_s26 = smov (%p26_p0, %s25_s26), 0  ;;  %s2491_s27 = smov (!%p26_p0, %s28_s27), %s1590_s24 }
   0x7   : > { %p277_p3 = pnand %p1408_p1, %p276_p2  ;;  %p30_p4 = scmp.ge.s32.totalorder %s2491_s27, 2 }
   0x8   : > { %s1409_s10 = sshll.u32 (!%p277_p3), %s1582_s22, 1  ;;  %p350_p5 = scmp.lt.s32.totalorder (!%p277_p3), %s1582_s22, 1 }
   0x9   : > { %s2493_s27 = smov (%p30_p4, %s2491_s27), 0  ;;  %280 = sbr.rel (%p277_p3) target bundleno = 426 (0x1aa), region = 44 }
   0xa   : > { %s329_s17 = sadd.s32 (!%p277_p3), %s1578_s21, %s1409_s10 }
   0xb   : > { %s1410_s7 = sshll.u32 (!%p277_p3), %s329_s17, 4 }
   0xc   : > { %p331_p6 = scmp.lt.s32.totalorder (!%p277_p3), %s1410_s7, 63 }
   0xe   : > { %v581_v0 = vld [vmem:[%s2480_s3 + $0xf0] sm:$0xff]  ;;  %v582_v2 = vld [vmem:[%s2480_s3 + $0xf8] sm:$0xff]  ;;  %v579_v4 = vld [vmem:[%s2480_s3 + $0xe0] sm:$0xff]  ;;  %s2495_s22 = smov (!%p350_p5, %s1582_s22), 1  ;;  %s2497_s7 = smov (!%p331_p6, %s1410_s7), 63  ;;  %vm599_vm0 = vcmask 523264  }
   0xf   : > { %v597_v1 = vld [vmem:[%s2480_s3 + $0x170] sm:$0xff]  ;;  %648 = vmatpush.msra.mxu0 %v581_v0  ;;  %v598_v3 = vld [vmem:[%s2480_s3 + $0x178] sm:$0xff]  ;;  %v595_v5 = vld [vmem:[%s2480_s3 + $0x160] sm:$0xff]  ;;  %778 = vmatpush.msra.mxu2 %v582_v2  ;;  %s1417_s8 = sshll.u32 %s2495_s22, 1  ;;  %s1731_s13 = sshll.u32 %s2497_s7, 4 }
  0x10   : > { %721 = vmatpush.msra.mxu1 %v597_v1  ;;  %851 = vmatpush.msra.mxu3 %v598_v3  ;;  %v580_v6 = vld [vmem:[%s2480_s3 + $0xe8] sm:$0xff]  ;;  %v577_v8 = vld [vmem:[%s2480_s3 + $0xd0] sm:$0xff]  ;;  %v578_v10 = vld [vmem:[%s2480_s3 + $0xd8] sm:$0xff]  ;;  %s353_s16 = scalar_lea.vmem %s2481_s4, %s1417_s8  ;;  %s1748_s7 = scalar_lea.vmem %s2478_s1, %s1731_s13 }
  0x11   : > { %v596_v7 = vld [vmem:[%s2480_s3 + $0x168] sm:$0xff]  ;;  %649 = vmatpush.msra.mxu0 %v579_v4  ;;  %v593_v9 = vld [vmem:[%s2480_s3 + $0x150] sm:$0xff]  ;;  %v594_v11 = vld [vmem:[%s2480_s3 + $0x158] sm:$0xff]  ;;  %779 = vmatpush.msra.mxu2 %v580_v6  ;;  %s2146_s30 = scalar_lea.vmem %s2477_s0, %s1731_s13  ;;  %s357_s9 = scalar_lea.vmem %s2482_s5, %s1417_s8 }
  0x12   : > { %722 = vmatpush.msra.mxu1 %v595_v5  ;;  %852 = vmatpush.msra.mxu3 %v596_v7  ;;  %v575_v12 = vld [vmem:[%s2480_s3 + $0xc0] sm:$0xff]  ;;  %v576_v14 = vld [vmem:[%s2480_s3 + $0xc8] sm:$0xff]  ;;  %v573_v16 = vld [vmem:[%s2480_s3 + $0xb0] sm:$0xff]  ;;  %s2339_s10 = scalar_lea.vmem %s2483_s6, %s1731_s13 }
  0x13   : > { %v591_v13 = vld [vmem:[%s2480_s3 + $0x140] sm:$0xff]  ;;  %650 = vmatpush.msra.mxu0 %v577_v8  ;;  %v592_v15 = vld [vmem:[%s2480_s3 + $0x148] sm:$0xff]  ;;  %780 = vmatpush.msra.mxu2 %v578_v10  ;;  %v589_v17 = vld [vmem:[%s2480_s3 + $0x130] sm:$0xff] }
  0x14   : > { %723 = vmatpush.msra.mxu1 %v593_v9  ;;  %853 = vmatpush.msra.mxu3 %v594_v11  ;;  %v574_v18 = vld [vmem:[%s2480_s3 + $0xb8] sm:$0xff]  ;;  %v571_v20 = vld [vmem:[%s2480_s3 + $0xa0] sm:$0xff]  ;;  %v572_v22 = vld [vmem:[%s2480_s3 + $0xa8] sm:$0xff] }
  0x15   : > { %651 = vmatpush.msra.mxu0 %v575_v12  ;;  %v590_v19 = vld [vmem:[%s2480_s3 + $0x138] sm:$0xff]  ;;  %781 = vmatpush.msra.mxu2 %v576_v14  ;;  %v587_v21 = vld [vmem:[%s2480_s3 + $0x120] sm:$0xff]  ;;  %v588_v23 = vld [vmem:[%s2480_s3 + $0x128] sm:$0xff] }
  0x16   : > { %724 = vmatpush.msra.mxu1 %v591_v13  ;;  %854 = vmatpush.msra.mxu3 %v592_v15  ;;  %v569_v24 = vld [vmem:[%s2480_s3 + $0x90] sm:$0xff]  ;;  %v369_v26 = vld [vmem:[%s353_s16] sm:$0x3]  ;;  %v570_v27 = vld [vmem:[%s2480_s3 + $0x98] sm:$0xff] }
  0x17   : > { %652 = vmatpush.msra.mxu0 %v573_v16  ;;  %782 = vmatpush.msra.mxu2 %v574_v18  ;;  %v585_v25 = vld [vmem:[%s2480_s3 + $0x110] sm:$0xff]  ;;  %v586_v28 = vld [vmem:[%s2480_s3 + $0x118] sm:$0xff]  ;;  %v1768_v29 = vperm.slane %v369_v26, 1  ;;  %v440_v30 = vld [vmem:[%s1748_s7 + $0x8] sm:$0xff]  ;;  %v1843_v56 = vperm.slane %v369_v26, 0 }
  0x18   : > { %725 = vmatpush.msra.mxu1 %v589_v17  ;;  %855 = vmatpush.msra.mxu3 %v590_v19  ;;  %v567_v31 = vld [vmem:[%s2480_s3 + $0x80] sm:$0xff]  ;;  %v568_v33 = vld [vmem:[%s2480_s3 + $0x88] sm:$0xff]  ;;  %v549_v36 = vld [vmem:[%s2479_s2 + $0x170] sm:$0xff] }
  0x19   : > { %653 = vmatpush.msra.mxu0 %v571_v20  ;;  %783 = vmatpush.msra.mxu2 %v572_v22  ;;  %v583_v32 = vld [vmem:[%s2480_s3 + $0x100] sm:$0xff]  ;;  %v584_v34 = vld [vmem:[%s2480_s3 + $0x108] sm:$0xff]  ;;  %v472_v35 = vsub.f32 %v440_v30, %v1768_v29  ;;  %v565_v37 = vld [vmem:[%s2480_s3 + $0x70] sm:$0xff] }
  0x1a   : > { %726 = vmatpush.msra.mxu1 %v587_v21  ;;  %856 = vmatpush.msra.mxu3 %v588_v23  ;;  %v566_v38 = vld [vmem:[%s2480_s3 + $0x78] sm:$0xff]  ;;  %v533_v39 = vld [vmem:[%s2479_s2 + $0xf0] sm:$0xff]  ;;  %v563_v40 = vld [vmem:[%s2480_s3 + $0x60] sm:$0xff] }
  0x1b   : > { %654 = vmatpush.msra.mxu0 %v569_v24  ;;  %784 = vmatpush.msra.mxu2 %v570_v27  ;;  %v564_v41 = vld [vmem:[%s2480_s3 + $0x68] sm:$0xff]  ;;  %v442_v42 = vld [vmem:[%s1748_s7 + $0x18] sm:$0xff]  ;;  %v531_v43 = vld [vmem:[%s2479_s2 + $0xe0] sm:$0xff] }
  0x1c   : > { %727 = vmatpush.msra.mxu1 %v585_v25  ;;  %857 = vmatpush.msra.mxu3 %v586_v28  ;;  %v547_v44 = vld [vmem:[%s2479_s2 + $0x160] sm:$0xff]  ;;  %v561_v45 = vld [vmem:[%s2480_s3 + $0x50] sm:$0xff]  ;;  %v562_v46 = vld [vmem:[%s2480_s3 + $0x58] sm:$0xff]  ;;  %v474_v49 = vsub.f32 %v442_v42, %v1768_v29 }
  0x1d   : > { %655 = vmatpush.msra.mxu0 %v567_v31  ;;  %785 = vmatpush.msra.mxu2 %v568_v33  ;;  %v529_v47 = vld [vmem:[%s2479_s2 + $0xd0] sm:$0xff]  ;;  %v559_v48 = vld [vmem:[%s2480_s3 + $0x40] sm:$0xff]  ;;  %v560_v50 = vld [vmem:[%s2480_s3 + $0x48] sm:$0xff] }
  0x1e   : > { %728 = vmatpush.msra.mxu1 %v583_v32  ;;  %858 = vmatpush.msra.mxu3 %v584_v34  ;;  %v545_v51 = vld [vmem:[%s2479_s2 + $0x150] sm:$0xff]  ;;  %v558_v53 = vld [vmem:[%s2480_s3 + $0x38] sm:$0xff]  ;;  %v527_v54 = vld [vmem:[%s2479_s2 + $0xc0] sm:$0xff] }
  0x1f   : > { %1423 = vmatmul.msk.f32.vlgmr.msra.gmra.mxu1 %vm599_vm0, %v472_v35  ;;  %1439 = vmatmul.msk.f32.vlgmr.msra.gmra.mxu3 %vm599_vm0, %v472_v35  ;;  %v557_v52 = vld [vmem:[%s2480_s3 + $0x30] sm:$0xff]  ;;  %v555_v55 = vld [vmem:[%s2480_s3 + $0x20] sm:$0xff]  ;;  %v556_v57 = vld [vmem:[%s2480_s3 + $0x28] sm:$0xff] }
  0x20   : > { %1029 = vmatpush.msrb.mxu3 %v549_v36  ;;  %656 = vmatpush.msra.mxu0 %v565_v37  ;;  %v439_v58 = vld [vmem:[%s1748_s7] sm:$0xff]  ;;  %v525_v59 = vld [vmem:[%s2479_s2 + $0xb0] sm:$0xff]  ;;  %v444_v61 = vld [vmem:[%s1748_s7 + $0x28] sm:$0xff] }
  0x21   : > { %786 = vmatpush.msra.mxu2 %v566_v38  ;;  %956 = vmatpush.msrb.mxu1 %v533_v39  ;;  %v553_v60 = vld [vmem:[%s2480_s3 + $0x10] sm:$0xff]  ;;  %v554_v62 = vld [vmem:[%s2480_s3 + $0x18] sm:$0xff]  ;;  %v523_v63 = vld [vmem:[%s2479_s2 + $0xa0] sm:$0xff]  ;;  %v471_v1 = vsub.f32 %v439_v58, %v1843_v56  ;;  %v476_v3 = vsub.f32 %v444_v61, %v1768_v29 }
  0x22   : > { %657 = vmatpush.msra.mxu0 %v563_v40  ;;  %1030 = vmatpush.msrb.mxu3 %v547_v44  ;;  %v551_v0 = vld [vmem:[%s2480_s3] sm:$0xff]  ;;  %v552_v2 = vld [vmem:[%s2480_s3 + $0x8] sm:$0xff]  ;;  %v1874_v4 = vld [vmem:[%s2479_s2 + $0x178] sm:$0xff] }
  0x23   : > { %787 = vmatpush.msra.mxu2 %v564_v41  ;;  %957 = vmatpush.msrb.mxu1 %v531_v43  ;;  %v1879_v5 = vld [vmem:[%s2479_s2 + $0xf8] sm:$0xff]  ;;  %v441_v6 = vld [vmem:[%s1748_s7 + $0x10] sm:$0xff]  ;;  %v1887_v8 = vld [vmem:[%s2479_s2 + $0x168] sm:$0xff] }
  0x24   : > { %658 = vmatpush.msra.mxu0 %v561_v45  ;;  %1031 = vmatpush.msrb.mxu3 %v545_v51  ;;  %v446_v7 = vld [vmem:[%s1748_s7 + $0x38] sm:$0xff]  ;;  %v1894_v9 = vld [vmem:[%s2479_s2 + $0xe8] sm:$0xff]  ;;  %v543_v10 = vld [vmem:[%s2479_s2 + $0x140] sm:$0xff]  ;;  %v473_v13 = vsub.f32 %v441_v6, %v1843_v56 }
  0x25   : > { %788 = vmatpush.msra.mxu2 %v562_v46  ;;  %958 = vmatpush.msrb.mxu1 %v529_v47  ;;  %v521_v11 = vld [vmem:[%s2479_s2 + $0x90] sm:$0xff]  ;;  %v1906_v12 = vld [vmem:[%s2479_s2 + $0x158] sm:$0xff]  ;;  %v478_v15 = vsub.f32 %v446_v7, %v1768_v29  ;;  %v1922_v16 = vld [vmem:[%s2479_s2 + $0xc8] sm:$0xff] }
  0x26   : > { %659 = vmatpush.msra.mxu0 %v559_v48  ;;  %1032 = vmatpush.msrb.mxu3 %v543_v10  ;;  %v1913_v14 = vld [vmem:[%s2479_s2 + $0xd8] sm:$0xff]  ;;  %v443_v17 = vld [vmem:[%s1748_s7 + $0x20] sm:$0xff]  ;;  %v448_v19 = vld [vmem:[%s1748_s7 + $0x48] sm:$0xff] }
  0x27   : > { %789 = vmatpush.msra.mxu2 %v560_v50  ;;  %1424 = vmatmul.msk.f32.gmra.mxu1 %vm599_vm0, %v474_v49  ;;  %v1929_v18 = vld [vmem:[%s2479_s2 + $0xb8] sm:$0xff]  ;;  %v519_v20 = vld [vmem:[%s2479_s2 + $0x80] sm:$0xff]  ;;  %v1940_v21 = vld [vmem:[%s2479_s2 + $0xa8] sm:$0xff]  ;;  %v475_v22 = vsub.f32 %v443_v17, %v1843_v56  ;;  %v480_v23 = vsub.f32 %v448_v19, %v1768_v29 }
  0x28   : > { %1440 = vmatmul.msk.f32.gmra.mxu3 %vm599_vm0, %v474_v49  ;;  %660 = vmatpush.msra.mxu0 %v557_v52  ;;  %v445_v24 = vld [vmem:[%s1748_s7 + $0x30] sm:$0xff]  ;;  %v450_v25 = vld [vmem:[%s1748_s7 + $0x58] sm:$0xff]  ;;  %v1956_v27 = vld [vmem:[%s2479_s2 + $0x148] sm:$0xff] }
  0x29   : > { %790 = vmatpush.msra.mxu2 %v558_v53  ;;  %959 = vmatpush.msrb.mxu1 %v527_v54  ;;  %v541_v26 = vld [vmem:[%s2479_s2 + $0x130] sm:$0xff]  ;;  %v1965_v30 = vld [vmem:[%s2479_s2 + $0x98] sm:$0xff]  ;;  %v477_v31 = vsub.f32 %v445_v24, %v1843_v56  ;;  %v482_v32 = vsub.f32 %v450_v25, %v1768_v29  ;;  %v447_v33 = vld [vmem:[%s1748_s7 + $0x40] sm:$0xff] }
  0x2a   : > { %661 = vmatpush.msra.mxu0 %v555_v55  ;;  %v517_v28 = vld [vmem:[%s2479_s2 + $0x70] sm:$0xff]  ;;  %1033 = vmatpush.msrb.mxu3 %v541_v26  ;;  %v452_v34 = vld [vmem:[%s1748_s7 + $0x68] sm:$0xff]  ;;  %v515_v35 = vld [vmem:[%s2479_s2 + $0x60] sm:$0xff]  ;;  %v479_v37 = vsub.f32 %v447_v33, %v1843_v56 }
  0x2b   : > { %791 = vmatpush.msra.mxu2 %v556_v57  ;;  %960 = vmatpush.msrb.mxu1 %v525_v59  ;;  %v1980_v36 = vld [vmem:[%s2479_s2 + $0x88] sm:$0xff]  ;;  %v484_v38 = vsub.f32 %v452_v34, %v1768_v29  ;;  %v449_v39 = vld [vmem:[%s1748_s7 + $0x50] sm:$0xff]  ;;  %v454_v40 = vld [vmem:[%s1748_s7 + $0x78] sm:$0xff] }
  0x2c   : > { %662 = vmatpush.msra.mxu0 %v553_v60  ;;  %v539_v41 = vld [vmem:[%s2479_s2 + $0x120] sm:$0xff]  ;;  %v1995_v42 = vld [vmem:[%s2479_s2 + $0x138] sm:$0xff]  ;;  %v513_v43 = vld [vmem:[%s2479_s2 + $0x50] sm:$0xff]  ;;  %v481_v45 = vsub.f32 %v449_v39, %v1843_v56  ;;  %v486_v46 = vsub.f32 %v454_v40, %v1768_v29 }
  0x2d   : > { %792 = vmatpush.msra.mxu2 %v554_v62  ;;  %961 = vmatpush.msrb.mxu1 %v523_v63  ;;  %v2004_v44 = vld [vmem:[%s2479_s2 + $0x78] sm:$0xff]  ;;  %v451_v47 = vld [vmem:[%s1748_s7 + $0x60] sm:$0xff]  ;;  %v456_v48 = vld [vmem:[%s1748_s7 + $0x88] sm:$0xff] }
  0x2e   : > { %663 = vmatpush.msra.mxu0 %v551_v0  ;;  %1034 = vmatpush.msrb.mxu3 %v539_v41  ;;  %v511_v49 = vld [vmem:[%s2479_s2 + $0x40] sm:$0xff]  ;;  %v2019_v50 = vld [vmem:[%s2479_s2 + $0x68] sm:$0xff]  ;;  %v483_v51 = vsub.f32 %v451_v47, %v1843_v56  ;;  %v488_v52 = vsub.f32 %v456_v48, %v1768_v29  ;;  %v453_v53 = vld [vmem:[%s1748_s7 + $0x70] sm:$0xff] }
  0x2f   : > { %793 = vmatpush.msra.mxu2 %v552_v2  ;;  %664 = vmatmul.f32.vlgmr.msra.gmra.mxu0 %v471_v1  ;;  %v458_v54 = vld [vmem:[%s1748_s7 + $0x98] sm:$0xff]  ;;  %v537_v55 = vld [vmem:[%s2479_s2 + $0x110] sm:$0xff]  ;;  %v2034_v57 = vld [vmem:[%s2479_s2 + $0x128] sm:$0xff]  ;;  %v485_v60 = vsub.f32 %v453_v53, %v1843_v56 }
  0x30   : > { %1425 = vmatmul.msk.f32.gmra.mxu1 %vm599_vm0, %v476_v3  ;;  %794 = vmatmul.f32.vlgmr.msra.gmra.mxu2 %v471_v1  ;;  %v509_v58 = vld [vmem:[%s2479_s2 + $0x30] sm:$0xff]  ;;  %v2043_v59 = vld [vmem:[%s2479_s2 + $0x58] sm:$0xff]  ;;  %v490_v61 = vsub.f32 %v458_v54, %v1768_v29  ;;  %v455_v62 = vld [vmem:[%s1748_s7 + $0x80] sm:$0xff] }
  0x31   : > { %1441 = vmatmul.msk.f32.gmra.mxu3 %vm599_vm0, %v476_v3  ;;  %1159 = vmatpush.msrb.mxu2 %v1874_v4  ;;  %v460_v63 = vld [vmem:[%s1748_s7 + $0xa8] sm:$0xff]  ;;  %v507_v0 = vld [vmem:[%s2479_s2 + $0x20] sm:$0xff]  ;;  %v487_v2 = vsub.f32 %v455_v62, %v1843_v56  ;;  %v457_v6 = vld [vmem:[%s1748_s7 + $0x90] sm:$0xff] }
  0x32   : > { %1086 = vmatpush.msrb.mxu0 %v1879_v5  ;;  %962 = vmatpush.msrb.mxu1 %v521_v11  ;;  %v2058_v1 = vld [vmem:[%s2479_s2 + $0x48] sm:$0xff]  ;;  %v492_v3 = vsub.f32 %v460_v63, %v1768_v29  ;;  %v462_v7 = vld [vmem:[%s1748_s7 + $0xb8] sm:$0xff]  ;;  %v535_v10 = vld [vmem:[%s2479_s2 + $0x100] sm:$0xff]  ;;  %v489_v17 = vsub.f32 %v457_v6, %v1843_v56 }
  0x33   : > { %1160 = vmatpush.msrb.mxu2 %v1887_v8  ;;  %1035 = vmatpush.msrb.mxu3 %v537_v55  ;;  %v538_v11 = vld [vmem:[%s2479_s2 + $0x118] sm:$0xff]  ;;  %v494_v19 = vsub.f32 %v462_v7, %v1768_v29  ;;  %v461_v25 = vld [vmem:[%s1748_s7 + $0xb0] sm:$0xff]  ;;  %v467_v34 = vld [vmem:[%s1748_s7 + $0xe0] sm:$0xff] }
  0x34   : > { %1087 = vmatpush.msrb.mxu0 %v1894_v9  ;;  %963 = vmatpush.msrb.mxu1 %v519_v20  ;;  %v459_v20 = vld [vmem:[%s1748_s7 + $0xa0] sm:$0xff]  ;;  %v466_v26 = vld [vmem:[%s1748_s7 + $0xd8] sm:$0xff]  ;;  %v469_v41 = vld [vmem:[%s1748_s7 + $0xf0] sm:$0xff] }
  0x35   : > { %1161 = vmatpush.msrb.mxu2 %v1906_v12  ;;  %1036 = vmatpush.msrb.mxu3 %v535_v10 }
  0x36   : > { %1088 = vmatpush.msrb.mxu0 %v1913_v14  ;;  %964 = vmatpush.msrb.mxu1 %v517_v28 }
  0x37   : > { %667 = vmatmul.f32.gmra.mxu0 %v473_v13  ;;  %1162 = vmatpush.msrb.mxu2 %v1956_v27 }
  0x38   : > { %1426 = vmatmul.msk.f32.gmra.mxu1 %vm599_vm0, %v478_v15  ;;  %797 = vmatmul.f32.gmra.mxu2 %v473_v13  ;;  %v505_v13 = vld [vmem:[%s2479_s2 + $0x10] sm:$0xff] }
  0x39   : > { %1442 = vmatmul.msk.f32.gmra.mxu3 %vm599_vm0, %v478_v15  ;;  %1089 = vmatpush.msrb.mxu0 %v1922_v16  ;;  %v2079_v15 = vld [vmem:[%s2479_s2 + $0x38] sm:$0xff] }
  0x3a   : > { %965 = vmatpush.msrb.mxu1 %v515_v35  ;;  %1163 = vmatpush.msrb.mxu2 %v1995_v42  ;;  %v370_v35 = vld [vmem:[%s2146_s30] sm:$0xff] }
  0x3b   : > { %1090 = vmatpush.msrb.mxu0 %v1929_v18  ;;  %1508 = vmatpush.msra.mxu3 %v1874_v4  ;;  %v508_v4 = vld [vmem:[%s2479_s2 + $0x28] sm:$0xff]  ;;  %v407_v39 = vsub.f32 %v370_v35, %v1843_v56 }
  0x3c   : > { %966 = vmatpush.msrb.mxu1 %v513_v43  ;;  %1164 = vmatpush.msrb.mxu2 %v2034_v57 }
  0x3d   : > { %1091 = vmatpush.msrb.mxu0 %v1940_v21  ;;  %1509 = vmatpush.msra.mxu3 %v1887_v8  ;;  %v491_v8 = vsub.f32 %v459_v20, %v1843_v56  ;;  %v381_v20 = vld [vmem:[%s2146_s30 + $0x58] sm:$0xff] }
  0x3e   : > { %967 = vmatpush.msrb.mxu1 %v511_v49  ;;  %1165 = vmatpush.msrb.mxu2 %v538_v11  ;;  %v374_v49 = vld [vmem:[%s2146_s30 + $0x20] sm:$0xff] }
  0x3f   : > { %670 = vmatmul.f32.gmra.mxu0 %v475_v22  ;;  %1510 = vmatpush.msra.mxu3 %v1906_v12  ;;  %v493_v12 = vsub.f32 %v461_v25, %v1843_v56  ;;  %v411_v53 = vsub.f32 %v374_v49, %v1843_v56 }
  0x40   : > { %1427 = vmatmul.msk.f32.gmra.mxu1 %vm599_vm0, %v480_v23  ;;  %800 = vmatmul.f32.gmra.mxu2 %v475_v22  ;;  %v464_v22 = vld [vmem:[%s1748_s7 + $0xc8] sm:$0xff] }
  0x41   : > { %1443 = vmatmul.msk.f32.gmra.mxu3 %vm599_vm0, %v480_v23  ;;  %1092 = vmatpush.msrb.mxu0 %v1965_v30  ;;  %v503_v23 = vld [vmem:[%s2479_s2] sm:$0xff]  ;;  %v496_v24 = vsub.f32 %v464_v22, %v1768_v29 }
  0x42   : > { %968 = vmatpush.msrb.mxu1 %v509_v58  ;;  %1511 = vmatpush.msra.mxu3 %v1956_v27  ;;  %v468_v27 = vld [vmem:[%s1748_s7 + $0xe8] sm:$0xff]  ;;  %v377_v58 = vld [vmem:[%s2146_s30 + $0x38] sm:$0xff] }
  0x43   : > { %1093 = vmatpush.msrb.mxu0 %v1980_v36  ;;  %v500_v28 = vsub.f32 %v468_v27, %v1768_v29 }
  0x44   : > { %969 = vmatpush.msrb.mxu1 %v507_v0  ;;  %1512 = vmatpush.msra.mxu3 %v1995_v42  ;;  %v372_v42 = vld [vmem:[%s2146_s30 + $0x10] sm:$0xff] }
  0x45   : > { %1094 = vmatpush.msrb.mxu0 %v2004_v44  ;;  %v409_v47 = vsub.f32 %v372_v42, %v1843_v56 }
  0x46   : > { %970 = vmatpush.msrb.mxu1 %v505_v13  ;;  %1513 = vmatpush.msra.mxu3 %v2034_v57  ;;  %v376_v57 = vld [vmem:[%s2146_s30 + $0x30] sm:$0xff] }
  0x47   : > { %673 = vmatmul.f32.gmra.mxu0 %v477_v31  ;;  %v413_v63 = vsub.f32 %v376_v57, %v1843_v56 }
  0x48   : > { %1428 = vmatmul.msk.f32.gmra.mxu1 %vm599_vm0, %v482_v32  ;;  %803 = vmatmul.f32.gmra.mxu2 %v477_v31  ;;  %v470_v31 = vld [vmem:[%s1748_s7 + $0xf8] sm:$0xff] }
  0x49   : > { %1444 = vmatmul.msk.f32.gmra.mxu3 %vm599_vm0, %v482_v32  ;;  %1095 = vmatpush.msrb.mxu0 %v2019_v50  ;;  %v502_v33 = vsub.f32 %v470_v31, %v1768_v29  ;;  %v385_v31 = vld [vmem:[%s2146_s30 + $0x78] sm:$0xff] }
  0x4a   : > { %971 = vmatpush.msrb.mxu1 %v503_v23  ;;  %1514 = vmatpush.msra.mxu3 %v538_v11 }
  0x4b   : > { %1096 = vmatpush.msrb.mxu0 %v2043_v59 }
  0x4c   : > { %1492 = vmatpush.msra.mxu1 %v1879_v5  ;;  %v536_v5 = vld [vmem:[%s2479_s2 + $0x108] sm:$0xff] }
  0x4d   : > { %1097 = vmatpush.msrb.mxu0 %v2058_v1  ;;  %1166 = vmatpush.msrb.mxu2 %v536_v5 }
  0x4e   : > { %1493 = vmatpush.msra.mxu1 %v1894_v9  ;;  %v506_v9 = vld [vmem:[%s2479_s2 + $0x18] sm:$0xff]  ;;  %1515 = vmatpush.msra.mxu3 %v536_v5  ;;  %v382_v5 = vld [vmem:[%s2146_s30 + $0x60] sm:$0xff] }
  0x4f   : > { %676 = vmatmul.f32.gmra.mxu0 %v479_v37 }
  0x50   : > { %1429 = vmatmul.msk.f32.gmra.mxu1 %vm599_vm0, %v484_v38  ;;  %806 = vmatmul.f32.gmra.mxu2 %v479_v37  ;;  %v499_v37 = vsub.f32 %v467_v34, %v1843_v56 }
  0x51   : > { %1445 = vmatmul.msk.f32.gmra.mxu3 %vm599_vm0, %v484_v38  ;;  %1098 = vmatpush.msrb.mxu0 %v2079_v15 }
  0x52   : > { %1494 = vmatpush.msra.mxu1 %v1913_v14  ;;  %v498_v14 = vsub.f32 %v466_v26, %v1768_v29  ;;  %v418_v26 = vsub.f32 %v381_v20, %v1768_v29 }
  0x53   : > { %1099 = vmatpush.msrb.mxu0 %v508_v4 }
  0x54   : > { %1495 = vmatpush.msra.mxu1 %v1922_v16  ;;  %v463_v16 = vld [vmem:[%s1748_s7 + $0xc0] sm:$0xff] }
  0x55   : > { %1100 = vmatpush.msrb.mxu0 %v506_v9 }
  0x56   : > { %1496 = vmatpush.msra.mxu1 %v1929_v18  ;;  %v495_v18 = vsub.f32 %v463_v16, %v1843_v56 }
  0x57   : > { %679 = vmatmul.f32.gmra.mxu0 %v481_v45 }
  0x58   : > { %1430 = vmatmul.msk.f32.gmra.mxu1 %vm599_vm0, %v486_v46  ;;  %809 = vmatmul.f32.gmra.mxu2 %v481_v45  ;;  %v501_v45 = vsub.f32 %v469_v41, %v1843_v56  ;;  %v387_v41 = vld [vmem:[%s2146_s30 + $0x88] sm:$0xff] }
  0x59   : > { %1446 = vmatmul.msk.f32.gmra.mxu3 %vm599_vm0, %v486_v46  ;;  %1497 = vmatpush.msra.mxu1 %v1940_v21  ;;  %v504_v21 = vld [vmem:[%s2479_s2 + $0x8] sm:$0xff]  ;;  %v424_v49 = vsub.f32 %v387_v41, %v1768_v29 }
  0x5a   : > { %1101 = vmatpush.msrb.mxu0 %v504_v21 }
  0x5b   : > { %1498 = vmatpush.msra.mxu1 %v1965_v30  ;;  %v465_v30 = vld [vmem:[%s1748_s7 + $0xd0] sm:$0xff] }
  0x5c   : > { %v497_v32 = vsub.f32 %v465_v30, %v1843_v56  ;;  %v384_v30 = vld [vmem:[%s2146_s30 + $0x70] sm:$0xff] }
  0x5d   : > { %1499 = vmatpush.msra.mxu1 %v1980_v36  ;;  %v371_v36 = vld [vmem:[%s2146_s30 + $0x8] sm:$0xff] }
  0x5e   : > { %v408_v40 = vsub.f32 %v371_v36, %v1768_v29  ;;  %v421_v36 = vsub.f32 %v384_v30, %v1843_v56 }
  0x5f   : > { %682 = vmatmul.f32.gmra.mxu0 %v483_v51  ;;  %1500 = vmatpush.msra.mxu1 %v2004_v44  ;;  %v373_v44 = vld [vmem:[%s2146_s30 + $0x18] sm:$0xff] }
  0x60   : > { %1431 = vmatmul.msk.f32.gmra.mxu1 %vm599_vm0, %v488_v52  ;;  %812 = vmatmul.f32.gmra.mxu2 %v483_v51  ;;  %v410_v48 = vsub.f32 %v373_v44, %v1768_v29 }
  0x61   : > { %1447 = vmatmul.msk.f32.gmra.mxu3 %vm599_vm0, %v488_v52  ;;  %1501 = vmatpush.msra.mxu1 %v2019_v50  ;;  %v375_v50 = vld [vmem:[%s2146_s30 + $0x28] sm:$0xff] }
  0x62   : > { %v412_v55 = vsub.f32 %v375_v50, %v1768_v29  ;;  %v388_v50 = vld [vmem:[%s2146_s30 + $0x90] sm:$0xff] }
  0x63   : > { %1502 = vmatpush.msra.mxu1 %v2043_v59 }
  0x65   : > { %1503 = vmatpush.msra.mxu1 %v2058_v1  ;;  %v414_v1 = vsub.f32 %v377_v58, %v1768_v29 }
  0x67   : > { %685 = vmatmul.f32.gmra.mxu0 %v485_v60  ;;  %1504 = vmatpush.msra.mxu1 %v2079_v15 }
  0x68   : > { %1432 = vmatmul.msk.f32.gmra.mxu1 %vm599_vm0, %v490_v61  ;;  %815 = vmatmul.f32.gmra.mxu2 %v485_v60 }
  0x69   : > { %1448 = vmatmul.msk.f32.gmra.mxu3 %vm599_vm0, %v490_v61  ;;  %1505 = vmatpush.msra.mxu1 %v508_v4 }
  0x6b   : > { %1506 = vmatpush.msra.mxu1 %v506_v9  ;;  %v383_v9 = vld [vmem:[%s2146_s30 + $0x68] sm:$0xff] }
  0x6d   : > { %1507 = vmatpush.msra.mxu1 %v504_v21 }
  0x6f   : > { %688 = vmatmul.f32.gmra.mxu0 %v487_v2 }
  0x70   : > { %1433 = vmatmul.msk.f32.gmra.mxu1 %vm599_vm0, %v492_v3  ;;  %818 = vmatmul.f32.gmra.mxu2 %v487_v2  ;;  %v378_v2 = vld [vmem:[%s2146_s30 + $0x40] sm:$0xff] }
  0x71   : > { %1449 = vmatmul.msk.f32.gmra.mxu3 %vm599_vm0, %v492_v3  ;;  %v379_v3 = vld [vmem:[%s2146_s30 + $0x48] sm:$0xff]  ;;  %v415_v13 = vsub.f32 %v378_v2, %v1843_v56  ;;  %v390_v2 = vld [vmem:[%s2146_s30 + $0xa0] sm:$0xff] }
  0x77   : > { %691 = vmatmul.f32.gmra.mxu0 %v489_v17 }
  0x78   : > { %1434 = vmatmul.msk.f32.gmra.mxu1 %vm599_vm0, %v494_v19  ;;  %821 = vmatmul.f32.gmra.mxu2 %v489_v17  ;;  %v416_v17 = vsub.f32 %v379_v3, %v1768_v29  ;;  %v391_v3 = vld [vmem:[%s2146_s30 + $0xa8] sm:$0xff] }
  0x79   : > { %1450 = vmatmul.msk.f32.gmra.mxu3 %vm599_vm0, %v494_v19  ;;  %v380_v19 = vld [vmem:[%s2146_s30 + $0x50] sm:$0xff] }
  0x7f   : > { %694 = vmatmul.f32.gmra.mxu0 %v491_v8 }
  0x80   : > { %1435 = vmatmul.msk.f32.gmra.mxu1 %vm599_vm0, %v496_v24  ;;  %824 = vmatmul.f32.gmra.mxu2 %v491_v8 }
  0x81   : > { %1451 = vmatmul.msk.f32.gmra.mxu3 %vm599_vm0, %v496_v24  ;;  %v417_v24 = vsub.f32 %v380_v19, %v1843_v56  ;;  %v427_v19 = vsub.f32 %v390_v2, %v1843_v56  ;;  %v398_v2 = vld [vmem:[%s2146_s30 + $0xe0] sm:$0xff] }
  0x87   : > { %697 = vmatmul.f32.gmra.mxu0 %v493_v12 }
  0x88   : > { %1436 = vmatmul.msk.f32.gmra.mxu1 %vm599_vm0, %v498_v14  ;;  %827 = vmatmul.f32.gmra.mxu2 %v493_v12 }
  0x89   : > { %1452 = vmatmul.msk.f32.gmra.mxu3 %vm599_vm0, %v498_v14 }
  0x8f   : > { %700 = vmatmul.f32.gmra.mxu0 %v495_v18 }
  0x90   : > { %1437 = vmatmul.msk.f32.gmra.mxu1 %vm599_vm0, %v500_v28  ;;  %830 = vmatmul.f32.gmra.mxu2 %v495_v18  ;;  %v419_v18 = vsub.f32 %v382_v5, %v1843_v56 }
  0x91   : > { %1453 = vmatmul.msk.f32.gmra.mxu3 %vm599_vm0, %v500_v28  ;;  %v420_v28 = vsub.f32 %v383_v9, %v1768_v29 }
  0x97   : > { %703 = vmatmul.f32.gmra.mxu0 %v497_v32 }
  0x98   : > { %1438 = vmatmul.msk.f32.gmra.mxu1 %vm599_vm0, %v502_v33  ;;  %833 = vmatmul.f32.gmra.mxu2 %v497_v32 }
  0x99   : > { %1454 = vmatmul.msk.f32.gmra.mxu3 %vm599_vm0, %v502_v33 }
  0x9c   : > { %v2154_v38 = vpop.f32.mrf.mxu1 }
  0x9f   : > { %706 = vmatmul.f32.gmra.mxu0 %v499_v37 }
  0xa0   : > { %836 = vmatmul.f32.gmra.mxu2 %v499_v37  ;;  %972 = vmatmul.f32.vlgmr.msrb.gmra.mxu1 %v407_v39 }
  0xa1   : > { %1455 = vmatmul.msk.f32.vlgmr.msrb.gmra.mxu3 %vm599_vm0, %v408_v40 }
  0xa2   : > { %v860_v43 = vpop.f32.mrf.mxu3 }
  0xa4   : > { %v2163_v46 = vpop.f32.mrf.mxu1 }
  0xa7   : > { %709 = vmatmul.f32.gmra.mxu0 %v501_v45 }
  0xa8   : > { %839 = vmatmul.f32.gmra.mxu2 %v501_v45  ;;  %975 = vmatmul.f32.gmra.mxu1 %v409_v47 }
  0xa9   : > { %1456 = vmatmul.msk.f32.gmra.mxu3 %vm599_vm0, %v410_v48 }
  0xab   : > { %v863_v51 = vpop.f32.mrf.mxu3 }
  0xac   : > { %v2170_v52 = vpop.f32.mrf.mxu0 }
  0xad   : > { %v2173_v54 = vpop.f32.mrf.mxu1 }
  0xaf   : > { %1102 = vmatmul.f32.vlgmr.msrb.gmra.mxu0 %v407_v39  ;;  %v422_v39 = vsub.f32 %v385_v31, %v1768_v29 }
  0xb0   : > { %978 = vmatmul.f32.gmra.mxu1 %v411_v53  ;;  %1471 = vmatmul.msk.f32.vlgmr.msrb.gmra.mxu2 %vm599_vm0, %v408_v40  ;;  %v386_v40 = vld [vmem:[%s2146_s30 + $0x80] sm:$0xff] }
  0xb1   : > { %1457 = vmatmul.msk.f32.gmra.mxu3 %vm599_vm0, %v412_v55 }
  0xb3   : > { %v795_v59 = vpop.f32.mrf.mxu2 }
  0xb4   : > { %v2180_v60 = vadd.f32 %v860_v43, %v795_v59  ;;  %v866_v61 = vpop.f32.mrf.mxu3  ;;  %v2182_v62 = vpop.f32.mrf.mxu0  ;;  %v425_v59 = vsub.f32 %v388_v50, %v1843_v56 }
  0xb5   : > { %v2185_v0 = vpop.f32.mrf.mxu1 }
  0xb7   : > { %1105 = vmatmul.f32.gmra.mxu0 %v409_v47  ;;  %v423_v47 = vsub.f32 %v386_v40, %v1843_v56 }
  0xb8   : > { %981 = vmatmul.f32.gmra.mxu1 %v413_v63  ;;  %1472 = vmatmul.msk.f32.gmra.mxu2 %vm599_vm0, %v410_v48 }
  0xb9   : > { %1458 = vmatmul.msk.f32.gmra.mxu3 %vm599_vm0, %v414_v1 }
  0xbb   : > { %v798_v6 = vpop.f32.mrf.mxu2 }
  0xbc   : > { %v2192_v7 = vadd.f32 %v863_v51, %v798_v6  ;;  %v869_v10 = vpop.f32.mrf.mxu3  ;;  %v2194_v11 = vpop.f32.mrf.mxu0  ;;  %v389_v51 = vld [vmem:[%s2146_s30 + $0x98] sm:$0xff] }
  0xbd   : > { %v2197_v15 = vpop.f32.mrf.mxu1 }
  0xbf   : > { %1108 = vmatmul.f32.gmra.mxu0 %v411_v53 }
  0xc0   : > { %984 = vmatmul.f32.gmra.mxu1 %v415_v13  ;;  %1473 = vmatmul.msk.f32.gmra.mxu2 %vm599_vm0, %v412_v55 }
  0xc1   : > { %1459 = vmatmul.msk.f32.gmra.mxu3 %vm599_vm0, %v416_v17 }
  0xc3   : > { %v801_v22 = vpop.f32.mrf.mxu2 }
  0xc4   : > { %v2204_v23 = vadd.f32 %v866_v61, %v801_v22  ;;  %v872_v4 = vpop.f32.mrf.mxu3  ;;  %v2206_v8 = vpop.f32.mrf.mxu0 }
  0xc5   : > { %v2209_v25 = vpop.f32.mrf.mxu1 }
  0xc7   : > { %1111 = vmatmul.f32.gmra.mxu0 %v413_v63 }
  0xc8   : > { %987 = vmatmul.f32.gmra.mxu1 %v417_v24  ;;  %1474 = vmatmul.msk.f32.gmra.mxu2 %vm599_vm0, %v414_v1  ;;  %v426_v1 = vsub.f32 %v389_v51, %v1768_v29 }
  0xc9   : > { %1460 = vmatmul.msk.f32.gmra.mxu3 %vm599_vm0, %v418_v26 }
  0xcb   : > { %v804_v12 = vpop.f32.mrf.mxu2 }
  0xcc   : > { %v2216_v14 = vadd.f32 %v869_v10, %v804_v12  ;;  %v875_v16 = vpop.f32.mrf.mxu3  ;;  %v2218_v27 = vpop.f32.mrf.mxu0 }
  0xcd   : > { %v2221_v21 = vpop.f32.mrf.mxu1 }
  0xcf   : > { %1114 = vmatmul.f32.gmra.mxu0 %v415_v13 }
  0xd0   : > { %990 = vmatmul.f32.gmra.mxu1 %v419_v18  ;;  %1475 = vmatmul.msk.f32.gmra.mxu2 %vm599_vm0, %v416_v17 }
  0xd1   : > { %1461 = vmatmul.msk.f32.gmra.mxu3 %vm599_vm0, %v420_v28 }
  0xd3   : > { %v807_v32 = vpop.f32.mrf.mxu2 }
  0xd4   : > { %v2228_v33 = vadd.f32 %v872_v4, %v807_v32  ;;  %v878_v34 = vpop.f32.mrf.mxu3  ;;  %v2230_v35 = vpop.f32.mrf.mxu0  ;;  %v428_v4 = vsub.f32 %v391_v3, %v1768_v29  ;;  %v394_v32 = vld [vmem:[%s2146_s30 + $0xc0] sm:$0xff]  ;;  %v399_v3 = vld [vmem:[%s2146_s30 + $0xe8] sm:$0xff] }
  0xd5   : > { %v751_v37 = vpop.f32.mrf.mxu1  ;;  %v431_v41 = vsub.f32 %v394_v32, %v1843_v56 }
  0xd7   : > { %1117 = vmatmul.f32.gmra.mxu0 %v417_v24  ;;  %v392_v24 = vld [vmem:[%s2146_s30 + $0xb0] sm:$0xff] }
  0xd8   : > { %993 = vmatmul.f32.gmra.mxu1 %v421_v36  ;;  %1476 = vmatmul.msk.f32.gmra.mxu2 %vm599_vm0, %v418_v26  ;;  %v393_v26 = vld [vmem:[%s2146_s30 + $0xb8] sm:$0xff] }
  0xd9   : > { %1462 = vmatmul.msk.f32.gmra.mxu3 %vm599_vm0, %v422_v39  ;;  %v430_v31 = vsub.f32 %v393_v26, %v1768_v29  ;;  %v436_v26 = vsub.f32 %v399_v3, %v1768_v29 }
  0xdb   : > { %v810_v42 = vpop.f32.mrf.mxu2 }
  0xdc   : > { %v2238_v43 = vadd.f32 %v875_v16, %v810_v42  ;;  %v881_v44 = vpop.f32.mrf.mxu3  ;;  %v2240_v45 = vpop.f32.mrf.mxu0 }
  0xdd   : > { %v754_v48 = vpop.f32.mrf.mxu1 }
  0xdf   : > { %1120 = vmatmul.f32.gmra.mxu0 %v419_v18  ;;  %v429_v18 = vsub.f32 %v392_v24, %v1843_v56 }
  0xe0   : > { %996 = vmatmul.f32.gmra.mxu1 %v423_v47  ;;  %1477 = vmatmul.msk.f32.gmra.mxu2 %vm599_vm0, %v420_v28 }
  0xe1   : > { %1463 = vmatmul.msk.f32.gmra.mxu3 %vm599_vm0, %v424_v49 }
  0xe3   : > { %v813_v53 = vpop.f32.mrf.mxu2 }
  0xe4   : > { %v2248_v55 = vadd.f32 %v878_v34, %v813_v53  ;;  %v884_v57 = vpop.f32.mrf.mxu3  ;;  %v686_v58 = vpop.f32.mrf.mxu0  ;;  %v395_v34 = vld [vmem:[%s2146_s30 + $0xc8] sm:$0xff] }
  0xe5   : > { %v2251_v61 = vadd.f32 %v751_v37, %v686_v58  ;;  %v757_v63 = vpop.f32.mrf.mxu1 }
  0xe7   : > { %1123 = vmatmul.f32.gmra.mxu0 %v421_v36 }
  0xe8   : > { %999 = vmatmul.f32.gmra.mxu1 %v425_v59  ;;  %1478 = vmatmul.msk.f32.gmra.mxu2 %vm599_vm0, %v422_v39 }
  0xe9   : > { %1464 = vmatmul.msk.f32.gmra.mxu3 %vm599_vm0, %v426_v1 }
  0xeb   : > { %v816_v6 = vpop.f32.mrf.mxu2 }
  0xec   : > { %v2258_v10 = vadd.f32 %v881_v44, %v816_v6  ;;  %v887_v13 = vpop.f32.mrf.mxu3  ;;  %v689_v17 = vpop.f32.mrf.mxu0 }
  0xed   : > { %v2261_v20 = vadd.f32 %v754_v48, %v689_v17  ;;  %v760_v22 = vpop.f32.mrf.mxu1  ;;  %v396_v48 = vld [vmem:[%s2146_s30 + $0xd0] sm:$0xff] }
  0xee   : > { %v433_v58 = vsub.f32 %v396_v48, %v1843_v56 }
  0xef   : > { %1126 = vmatmul.f32.gmra.mxu0 %v423_v47  ;;  %v432_v47 = vsub.f32 %v395_v34, %v1768_v29 }
  0xf0   : > { %1002 = vmatmul.f32.gmra.mxu1 %v427_v19  ;;  %1479 = vmatmul.msk.f32.gmra.mxu2 %vm599_vm0, %v424_v49  ;;  %v397_v49 = vld [vmem:[%s2146_s30 + $0xd8] sm:$0xff] }
  0xf1   : > { %1465 = vmatmul.msk.f32.gmra.mxu3 %vm599_vm0, %v428_v4 }
  0xf3   : > { %v819_v5 = vpop.f32.mrf.mxu2 }
  0xf4   : > { %v2268_v9 = vadd.f32 %v884_v57, %v819_v5  ;;  %v890_v12 = vpop.f32.mrf.mxu3  ;;  %v692_v16 = vpop.f32.mrf.mxu0  ;;  %v400_v5 = vld [vmem:[%s2146_s30 + $0xf0] sm:$0xff] }
  0xf5   : > { %v2271_v28 = vadd.f32 %v757_v63, %v692_v16  ;;  %v763_v30 = vpop.f32.mrf.mxu1  ;;  %v437_v32 = vsub.f32 %v400_v5, %v1843_v56 }
  0xf7   : > { %1129 = vmatmul.f32.gmra.mxu0 %v425_v59 }
  0xf8   : > { %1005 = vmatmul.f32.gmra.mxu1 %v429_v18  ;;  %1480 = vmatmul.msk.f32.gmra.mxu2 %vm599_vm0, %v426_v1  ;;  %v434_v1 = vsub.f32 %v397_v49, %v1768_v29 }
  0xf9   : > { %1466 = vmatmul.msk.f32.gmra.mxu3 %vm599_vm0, %v430_v31 }
  0xfb   : > { %v822_v36 = vpop.f32.mrf.mxu2 }
  0xfc   : > { %v2278_v37 = vadd.f32 %v887_v13, %v822_v36  ;;  %v893_v39 = vpop.f32.mrf.mxu3  ;;  %v695_v40 = vpop.f32.mrf.mxu0 }
  0xfd   : > { %v2281_v42 = vadd.f32 %v760_v22, %v695_v40  ;;  %v766_v44 = vpop.f32.mrf.mxu1  ;;  %v435_v22 = vsub.f32 %v398_v2, %v1843_v56  ;;  %v731_v56 = vadd.f32 %v2154_v38, %v2170_v52  ;;  %v734_v52 = vadd.f32 %v2163_v46, %v2182_v62 }
  0xff   : > { %1132 = vmatmul.f32.gmra.mxu0 %v427_v19 }
 0x100   : > { %1008 = vmatmul.f32.gmra.mxu1 %v431_v41  ;;  %1481 = vmatmul.msk.f32.gmra.mxu2 %vm599_vm0, %v428_v4 }
 0x101   : > { %1467 = vmatmul.msk.f32.gmra.mxu3 %vm599_vm0, %v432_v47 }
 0x103   : > { %v825_v50 = vpop.f32.mrf.mxu2 }
 0x104   : > { %v2288_v51 = vadd.f32 %v890_v12, %v825_v50  ;;  %v896_v53 = vpop.f32.mrf.mxu3  ;;  %v698_v57 = vpop.f32.mrf.mxu0  ;;  %v401_v12 = vld [vmem:[%s2146_s30 + $0xf8] sm:$0xff] }
 0x105   : > { %v2291_v59 = vadd.f32 %v763_v30, %v698_v57  ;;  %v769_v63 = vpop.f32.mrf.mxu1 }
 0x107   : > { %1135 = vmatmul.f32.gmra.mxu0 %v429_v18 }
 0x108   : > { %1011 = vmatmul.f32.gmra.mxu1 %v433_v58  ;;  %1482 = vmatmul.msk.f32.gmra.mxu2 %vm599_vm0, %v430_v31 }
 0x109   : > { %1468 = vmatmul.msk.f32.gmra.mxu3 %vm599_vm0, %v434_v1 }
 0x10b   : > { %v828_v6 = vpop.f32.mrf.mxu2 }
 0x10c   : > { %v2298_v13 = vadd.f32 %v893_v39, %v828_v6  ;;  %v899_v17 = vpop.f32.mrf.mxu3  ;;  %v701_v19 = vpop.f32.mrf.mxu0  ;;  %v438_v39 = vsub.f32 %v401_v12, %v1768_v29  ;;  %v1216_v29 = vld [vmem:[%s357_s9] sm:$0x3] }
 0x10d   : > { %v2301_v4 = vadd.f32 %v766_v44, %v701_v19  ;;  %v772_v24 = vpop.f32.mrf.mxu1  ;;  %v2329_v57 = vperm.slane %v1216_v29, 0  ;;  %v2352_v46 = vperm.slane %v1216_v29, 1 }
 0x10f   : > { %1138 = vmatmul.f32.gmra.mxu0 %v431_v41 }
 0x110   : > { %1014 = vmatmul.f32.gmra.mxu1 %v435_v22  ;;  %1483 = vmatmul.msk.f32.gmra.mxu2 %vm599_vm0, %v432_v47 }
 0x111   : > { %1469 = vmatmul.msk.f32.gmra.mxu3 %vm599_vm0, %v436_v26 }
 0x113   : > { %v831_v16 = vpop.f32.mrf.mxu2 }
 0x114   : > { %v2308_v18 = vadd.f32 %v896_v53, %v831_v16  ;;  %v902_v30 = vpop.f32.mrf.mxu3  ;;  %v704_v31 = vpop.f32.mrf.mxu0 }
 0x115   : > { %v2311_v34 = vadd.f32 %v769_v63, %v704_v31  ;;  %v775_v36 = vpop.f32.mrf.mxu1 }
 0x117   : > { %1141 = vmatmul.f32.gmra.mxu0 %v433_v58 }
 0x118   : > { %1017 = vmatmul.f32.gmra.mxu1 %v437_v32  ;;  %1484 = vmatmul.msk.f32.gmra.mxu2 %vm599_vm0, %v434_v1 }
 0x119   : > { %1470 = vmatmul.msk.f32.gmra.mxu3 %vm599_vm0, %v438_v39 }
 0x11b   : > { %v834_v40 = vpop.f32.mrf.mxu2 }
 0x11c   : > { %v2316_v41 = vadd.f32 %v899_v17, %v834_v40  ;;  %v905_v44 = vpop.f32.mrf.mxu3  ;;  %v707_v47 = vpop.f32.mrf.mxu0 }
 0x11d   : > { %v2318_v48 = vadd.f32 %v772_v24, %v707_v47  ;;  %v973_v49 = vpop.f32.mrf.mxu1 }
 0x11e   : > { %v974_v50 = vadd.f32 %v973_v49, %v731_v56 }
 0x11f   : > { %1144 = vmatmul.f32.gmra.mxu0 %v435_v22 }
 0x120   : > { %1147 = vmatmul.f32.vlgmr.msra.gmra.mxu1 %v437_v32  ;;  %1485 = vmatmul.msk.f32.gmra.mxu2 %vm599_vm0, %v436_v26 }
 0x121   : > { %1486 = vmatmul.msk.f32.vlgmr.msra.gmra.mxu3 %vm599_vm0, %v438_v39 }
 0x123   : > { %v837_v53 = vpop.f32.mrf.mxu2 }
 0x124   : > { %v2331_v58 = vadd.f32 %v902_v30, %v837_v53  ;;  %v1038_v63 = vpop.f32.mrf.mxu3  ;;  %v710_v1 = vpop.f32.mrf.mxu0  ;;  %v737_v30 = vadd.f32 %v2173_v54, %v2194_v11  ;;  %v740_v54 = vadd.f32 %v2185_v0, %v2206_v8  ;;  %v743_v0 = vadd.f32 %v2197_v15, %v2218_v27 }
 0x125   : > { %v1039_v2 = vadd.f32 %v1038_v63, %v974_v50  ;;  %v2333_v3 = vadd.f32 %v775_v36, %v710_v1  ;;  %v976_v6 = vpop.f32.mrf.mxu1  ;;  %v746_v15 = vadd.f32 %v2209_v25, %v2230_v35  ;;  %v749_v25 = vadd.f32 %v2221_v21, %v2240_v45 }
 0x126   : > { %v977_v17 = vadd.f32 %v976_v6, %v734_v52 }
 0x127   : > { %v1222_v38 = vadd.f32 %v2329_v57, %v1039_v2 }
 0x129   : > { %1254 = vst [vmem:[%s2339_s10] sm:$0xff] %v1222_v38 }
 0x12b   : > { %v840_v19 = vpop.f32.mrf.mxu2 }
 0x12c   : > { %v2345_v22 = vadd.f32 %v905_v44, %v840_v19  ;;  %v1041_v24 = vpop.f32.mrf.mxu3  ;;  %v1103_v26 = vpop.f32.mrf.mxu0 }
 0x12d   : > { %v1042_v5 = vadd.f32 %v1041_v24, %v977_v17  ;;  %v979_v12 = vpop.f32.mrf.mxu1  ;;  %v1104_v31 = vadd.f32 %v1103_v26, %v2180_v60 }
 0x12e   : > { %v980_v62 = vadd.f32 %v979_v12, %v737_v30 }
 0x12f   : > { %v1224_v16 = vadd.f32 %v2329_v57, %v1042_v5 }
 0x131   : > { %1256 = vst [vmem:[%s2339_s10 + $0x10] sm:$0xff] %v1224_v16 }
 0x133   : > { %v1168_v32 = vpop.f32.mrf.mxu2 }
 0x134   : > { %v1044_v36 = vpop.f32.mrf.mxu3  ;;  %v1169_v39 = vadd.f32 %v1168_v32, %v1104_v31  ;;  %v1106_v40 = vpop.f32.mrf.mxu0 }
 0x135   : > { %v1045_v44 = vadd.f32 %v1044_v36, %v980_v62  ;;  %v982_v47 = vpop.f32.mrf.mxu1  ;;  %v1107_v60 = vadd.f32 %v1106_v40, %v2192_v7 }
 0x136   : > { %v1223_v49 = vadd.f32 %v2352_v46, %v1169_v39  ;;  %v983_v11 = vadd.f32 %v982_v47, %v740_v54 }
 0x137   : > { %v1226_v56 = vadd.f32 %v2329_v57, %v1045_v44 }
 0x138   : > { %1255 = vst.msk [vmem:[%s2339_s10 + $0x8] sm:$0xff] %vm599_vm0, %v1223_v49 }
 0x139   : > { %1258 = vst [vmem:[%s2339_s10 + $0x20] sm:$0xff] %v1226_v56 }
 0x13b   : > { %v1171_v29 = vpop.f32.mrf.mxu2 }
 0x13c   : > { %v1047_v50 = vpop.f32.mrf.mxu3  ;;  %v1172_v53 = vadd.f32 %v1171_v29, %v1107_v60  ;;  %v1109_v63 = vpop.f32.mrf.mxu0 }
 0x13d   : > { %v1048_v1 = vadd.f32 %v1047_v50, %v983_v11  ;;  %v985_v2 = vpop.f32.mrf.mxu1  ;;  %v1110_v7 = vadd.f32 %v1109_v63, %v2204_v23 }
 0x13e   : > { %v1225_v6 = vadd.f32 %v2352_v46, %v1172_v53  ;;  %v986_v8 = vadd.f32 %v985_v2, %v743_v0 }
 0x13f   : > { %v1228_v38 = vadd.f32 %v2329_v57, %v1048_v1 }
 0x140   : > { %1257 = vst.msk [vmem:[%s2339_s10 + $0x18] sm:$0xff] %vm599_vm0, %v1225_v6 }
 0x141   : > { %1260 = vst [vmem:[%s2339_s10 + $0x30] sm:$0xff] %v1228_v38 }
 0x143   : > { %v1174_v52 = vpop.f32.mrf.mxu2 }
 0x144   : > { %v1050_v17 = vpop.f32.mrf.mxu3  ;;  %v1175_v19 = vadd.f32 %v1174_v52, %v1110_v7  ;;  %v1112_v24 = vpop.f32.mrf.mxu0 }
 0x145   : > { %v1051_v26 = vadd.f32 %v1050_v17, %v986_v8  ;;  %v988_v5 = vpop.f32.mrf.mxu1  ;;  %v1113_v23 = vadd.f32 %v1112_v24, %v2216_v14 }
 0x146   : > { %v1227_v12 = vadd.f32 %v2352_v46, %v1175_v19  ;;  %v989_v27 = vadd.f32 %v988_v5, %v746_v15 }
 0x147   : > { %v1230_v16 = vadd.f32 %v2329_v57, %v1051_v26 }
 0x148   : > { %1259 = vst.msk [vmem:[%s2339_s10 + $0x28] sm:$0xff] %vm599_vm0, %v1227_v12 }
 0x149   : > { %1262 = vst [vmem:[%s2339_s10 + $0x40] sm:$0xff] %v1230_v16 }
 0x14b   : > { %v1177_v30 = vpop.f32.mrf.mxu2 }
 0x14c   : > { %v1053_v31 = vpop.f32.mrf.mxu3  ;;  %v1178_v62 = vadd.f32 %v1177_v30, %v1113_v23  ;;  %v1115_v32 = vpop.f32.mrf.mxu0 }
 0x14d   : > { %v1054_v36 = vadd.f32 %v1053_v31, %v989_v27  ;;  %v991_v39 = vpop.f32.mrf.mxu1  ;;  %v1116_v14 = vadd.f32 %v1115_v32, %v2228_v33 }
 0x14e   : > { %v1229_v40 = vadd.f32 %v2352_v46, %v1178_v62  ;;  %v992_v35 = vadd.f32 %v991_v39, %v749_v25 }
 0x14f   : > { %v1232_v44 = vadd.f32 %v2329_v57, %v1054_v36 }
 0x150   : > { %1261 = vst.msk [vmem:[%s2339_s10 + $0x38] sm:$0xff] %vm599_vm0, %v1229_v40 }
 0x151   : > { %1264 = vst [vmem:[%s2339_s10 + $0x50] sm:$0xff] %v1232_v44 }
 0x153   : > { %v1180_v47 = vpop.f32.mrf.mxu2 }
 0x154   : > { %v1056_v49 = vpop.f32.mrf.mxu3  ;;  %v1181_v56 = vadd.f32 %v1180_v47, %v1116_v14  ;;  %v1118_v54 = vpop.f32.mrf.mxu0 }
 0x155   : > { %v1057_v60 = vadd.f32 %v1056_v49, %v992_v35  ;;  %v994_v11 = vpop.f32.mrf.mxu1  ;;  %v1119_v21 = vadd.f32 %v1118_v54, %v2238_v43 }
 0x156   : > { %v1231_v29 = vadd.f32 %v2352_v46, %v1181_v56  ;;  %v995_v33 = vadd.f32 %v994_v11, %v2251_v61 }
 0x157   : > { %v1234_v50 = vadd.f32 %v2329_v57, %v1057_v60 }
 0x158   : > { %1263 = vst.msk [vmem:[%s2339_s10 + $0x48] sm:$0xff] %vm599_vm0, %v1231_v29 }
 0x159   : > { %1266 = vst [vmem:[%s2339_s10 + $0x60] sm:$0xff] %v1234_v50 }
 0x15b   : > { %v1183_v45 = vpop.f32.mrf.mxu2 }
 0x15c   : > { %v1059_v53 = vpop.f32.mrf.mxu3  ;;  %v1184_v63 = vadd.f32 %v1183_v45, %v1119_v21  ;;  %v1121_v1 = vpop.f32.mrf.mxu0 }
 0x15d   : > { %v1060_v2 = vadd.f32 %v1059_v53, %v995_v33  ;;  %v997_v6 = vpop.f32.mrf.mxu1  ;;  %v1122_v7 = vadd.f32 %v1121_v1, %v2248_v55 }
 0x15e   : > { %v1233_v38 = vadd.f32 %v2352_v46, %v1184_v63  ;;  %v998_v43 = vadd.f32 %v997_v6, %v2261_v20 }
 0x15f   : > { %v1236_v0 = vadd.f32 %v2329_v57, %v1060_v2 }
 0x160   : > { %1265 = vst.msk [vmem:[%s2339_s10 + $0x58] sm:$0xff] %vm599_vm0, %v1233_v38 }
 0x161   : > { %1268 = vst [vmem:[%s2339_s10 + $0x70] sm:$0xff] %v1236_v0 }
 0x163   : > { %v1186_v61 = vpop.f32.mrf.mxu2 }
 0x164   : > { %v1062_v8 = vpop.f32.mrf.mxu3  ;;  %v1187_v52 = vadd.f32 %v1186_v61, %v1122_v7  ;;  %v1124_v17 = vpop.f32.mrf.mxu0 }
 0x165   : > { %v1063_v19 = vadd.f32 %v1062_v8, %v998_v43  ;;  %v1000_v24 = vpop.f32.mrf.mxu1  ;;  %v1125_v12 = vadd.f32 %v1124_v17, %v2258_v10 }
 0x166   : > { %v1235_v26 = vadd.f32 %v2352_v46, %v1187_v52  ;;  %v1001_v55 = vadd.f32 %v1000_v24, %v2271_v28 }
 0x167   : > { %v1238_v5 = vadd.f32 %v2329_v57, %v1063_v19 }
 0x168   : > { %1267 = vst.msk [vmem:[%s2339_s10 + $0x68] sm:$0xff] %vm599_vm0, %v1235_v26 }
 0x169   : > { %1270 = vst [vmem:[%s2339_s10 + $0x80] sm:$0xff] %v1238_v5 }
 0x16b   : > { %v1189_v20 = vpop.f32.mrf.mxu2 }
 0x16c   : > { %v1065_v16 = vpop.f32.mrf.mxu3  ;;  %v1190_v15 = vadd.f32 %v1189_v20, %v1125_v12  ;;  %v1127_v23 = vpop.f32.mrf.mxu0 }
 0x16d   : > { %v1066_v27 = vadd.f32 %v1065_v16, %v1001_v55  ;;  %v1003_v30 = vpop.f32.mrf.mxu1  ;;  %v1128_v32 = vadd.f32 %v1127_v23, %v2268_v9 }
 0x16e   : > { %v1237_v31 = vadd.f32 %v2352_v46, %v1190_v15  ;;  %v1004_v10 = vadd.f32 %v1003_v30, %v2281_v42 }
 0x16f   : > { %v1240_v62 = vadd.f32 %v2329_v57, %v1066_v27 }
 0x170   : > { %1269 = vst.msk [vmem:[%s2339_s10 + $0x78] sm:$0xff] %vm599_vm0, %v1237_v31 }
 0x171   : > { %1272 = vst [vmem:[%s2339_s10 + $0x90] sm:$0xff] %v1240_v62 }
 0x173   : > { %v1192_v28 = vpop.f32.mrf.mxu2 }
 0x174   : > { %v1068_v36 = vpop.f32.mrf.mxu3  ;;  %v1193_v39 = vadd.f32 %v1192_v28, %v1128_v32  ;;  %v1130_v40 = vpop.f32.mrf.mxu0 }
 0x175   : > { %v1069_v44 = vadd.f32 %v1068_v36, %v1004_v10  ;;  %v1006_v25 = vpop.f32.mrf.mxu1  ;;  %v1131_v47 = vadd.f32 %v1130_v40, %v2278_v37 }
 0x176   : > { %v1239_v14 = vadd.f32 %v2352_v46, %v1193_v39  ;;  %v1007_v9 = vadd.f32 %v1006_v25, %v2291_v59 }
 0x177   : > { %v1242_v35 = vadd.f32 %v2329_v57, %v1069_v44 }
 0x178   : > { %1271 = vst.msk [vmem:[%s2339_s10 + $0x88] sm:$0xff] %vm599_vm0, %v1239_v14 }
 0x179   : > { %1274 = vst [vmem:[%s2339_s10 + $0xa0] sm:$0xff] %v1242_v35 }
 0x17b   : > { %v1195_v42 = vpop.f32.mrf.mxu2 }
 0x17c   : > { %v1071_v49 = vpop.f32.mrf.mxu3  ;;  %v1196_v56 = vadd.f32 %v1195_v42, %v1131_v47  ;;  %v1133_v54 = vpop.f32.mrf.mxu0 }
 0x17d   : > { %v1072_v60 = vadd.f32 %v1071_v49, %v1007_v9  ;;  %v1009_v11 = vpop.f32.mrf.mxu1  ;;  %v1134_v21 = vadd.f32 %v1133_v54, %v2288_v51 }
 0x17e   : > { %v1241_v29 = vadd.f32 %v2352_v46, %v1196_v56  ;;  %v1010_v37 = vadd.f32 %v1009_v11, %v2301_v4 }
 0x17f   : > { %v1244_v50 = vadd.f32 %v2329_v57, %v1072_v60 }
 0x180   : > { %1273 = vst.msk [vmem:[%s2339_s10 + $0x98] sm:$0xff] %vm599_vm0, %v1241_v29 }
 0x181   : > { %1276 = vst [vmem:[%s2339_s10 + $0xb0] sm:$0xff] %v1244_v50 }
 0x183   : > { %v1198_v59 = vpop.f32.mrf.mxu2 }
 0x184   : > { %v1074_v33 = vpop.f32.mrf.mxu3  ;;  %v1199_v45 = vadd.f32 %v1198_v59, %v1134_v21  ;;  %v1136_v53 = vpop.f32.mrf.mxu0 }
 0x185   : > { %v1075_v63 = vadd.f32 %v1074_v33, %v1010_v37  ;;  %v1012_v1 = vpop.f32.mrf.mxu1  ;;  %v1137_v38 = vadd.f32 %v1136_v53, %v2298_v13 }
 0x186   : > { %v1243_v2 = vadd.f32 %v2352_v46, %v1199_v45  ;;  %v1013_v51 = vadd.f32 %v1012_v1, %v2311_v34 }
 0x187   : > { %v1246_v6 = vadd.f32 %v2329_v57, %v1075_v63 }
 0x188   : > { %1275 = vst.msk [vmem:[%s2339_s10 + $0xa8] sm:$0xff] %vm599_vm0, %v1243_v2 }
 0x189   : > { %1278 = vst [vmem:[%s2339_s10 + $0xc0] sm:$0xff] %v1246_v6 }
 0x18b   : > { %v1201_v4 = vpop.f32.mrf.mxu2 }
 0x18c   : > { %v1077_v0 = vpop.f32.mrf.mxu3  ;;  %v1202_v7 = vadd.f32 %v1201_v4, %v1137_v38  ;;  %v1139_v43 = vpop.f32.mrf.mxu0 }
 0x18d   : > { %v1078_v61 = vadd.f32 %v1077_v0, %v1013_v51  ;;  %v1015_v8 = vpop.f32.mrf.mxu1  ;;  %v1140_v19 = vadd.f32 %v1139_v43, %v2308_v18 }
 0x18e   : > { %v1245_v52 = vadd.f32 %v2352_v46, %v1202_v7  ;;  %v1016_v13 = vadd.f32 %v1015_v8, %v2318_v48 }
 0x18f   : > { %v1248_v17 = vadd.f32 %v2329_v57, %v1078_v61 }
 0x190   : > { %1277 = vst.msk [vmem:[%s2339_s10 + $0xb8] sm:$0xff] %vm599_vm0, %v1245_v52 }
 0x191   : > { %1280 = vst [vmem:[%s2339_s10 + $0xd0] sm:$0xff] %v1248_v17 }
 0x193   : > { %v1204_v34 = vpop.f32.mrf.mxu2 }
 0x194   : > { %v1080_v24 = vpop.f32.mrf.mxu3  ;;  %v1205_v26 = vadd.f32 %v1204_v34, %v1140_v19  ;;  %v1142_v12 = vpop.f32.mrf.mxu0 }
 0x195   : > { %v1081_v5 = vadd.f32 %v1080_v24, %v1016_v13  ;;  %v1018_v20 = vpop.f32.mrf.mxu1  ;;  %v1143_v15 = vadd.f32 %v1142_v12, %v2316_v41 }
 0x196   : > { %v1247_v55 = vadd.f32 %v2352_v46, %v1205_v26  ;;  %v1019_v18 = vadd.f32 %v1018_v20, %v2333_v3 }
 0x197   : > { %v1250_v16 = vadd.f32 %v2329_v57, %v1081_v5 }
 0x198   : > { %1279 = vst.msk [vmem:[%s2339_s10 + $0xc8] sm:$0xff] %vm599_vm0, %v1247_v55 }
 0x199   : > { %1282 = vst [vmem:[%s2339_s10 + $0xe0] sm:$0xff] %v1250_v16 }
 0x19b   : > { %v1207_v48 = vpop.f32.mrf.mxu2 }
 0x19c   : > { %v1083_v23 = vpop.f32.mrf.mxu3  ;;  %v1208_v27 = vadd.f32 %v1207_v48, %v1143_v15  ;;  %v1145_v32 = vpop.f32.mrf.mxu0 }
 0x19d   : > { %v1084_v30 = vadd.f32 %v1083_v23, %v1019_v18  ;;  %v1148_v10 = vpop.f32.mrf.mxu1  ;;  %v1146_v28 = vadd.f32 %v1145_v32, %v2331_v58 }
 0x19e   : > { %v1249_v31 = vadd.f32 %v2352_v46, %v1208_v27  ;;  %v1149_v41 = vadd.f32 %v1148_v10, %v2345_v22 }
 0x19f   : > { %v1252_v62 = vadd.f32 %v2329_v57, %v1084_v30 }
 0x1a0   : > { %1281 = vst.msk [vmem:[%s2339_s10 + $0xd8] sm:$0xff] %vm599_vm0, %v1249_v31 }
 0x1a1   : > { %1284 = vst [vmem:[%s2339_s10 + $0xf0] sm:$0xff] %v1252_v62 }
 0x1a3   : > { %v1210_v3 = vpop.f32.mrf.mxu2 }
 0x1a4   : > { %v1211_v36 = vadd.f32 %v1210_v3, %v1146_v28  ;;  %v1213_v39 = vpop.f32.mrf.mxu3 }
 0x1a5   : > { %v1214_v40 = vadd.f32 %v1213_v39, %v1149_v41 }
 0x1a6   : > { %v1251_v44 = vadd.f32 %v2352_v46, %v1211_v36 }
 0x1a7   : > { %v1253_v25 = vadd.f32 %v2352_v46, %v1214_v40 }
 0x1a8   : > { %1283 = vst.msk [vmem:[%s2339_s10 + $0xe8] sm:$0xff] %vm599_vm0, %v1251_v44 }
 0x1a9   : > { %1285 = vst.msk [vmem:[%s2339_s10 + $0xf8] sm:$0xff] %vm599_vm0, %v1253_v25 }
 0x1aa PF: > { %s16_s25 = sadd.s32 1, %s1594_s25   ;;  %s2484_s21 = smov %s1586_s23 }
 0x1ab   : > { %p13_p7 = scmp.ge.s32.totalorder %s16_s25, 6   ;;  %s2485_s22 = smov %s1590_s24 }
 0x1ac   : > { %s2486_s23 = smov %s2489_s26  ;;  %s2487_s24 = smov %s2493_s27 }
 0x1ad   :  { %15 = sbr.rel (!%p13_p7) target bundleno = 3 (0x3), region = 83 }

</bundles_post_ra>
